<compile_context>
chip_gen: v6e
topology: v6e:2x2x1
jax: 0.10.0
libtpu: 0.0.40
codegen_flags: <defaults>
</compile_context>

<pallas_src>
import functools

import numpy as np
import jax
import jax.numpy as jnp
from jax.experimental import pallas as pl
from jax.experimental.pallas import tpu as pltpu

BN_EPS = 1e-5
GRID_SIZE = 5
SPLINE_ORDER = 3
GRID_RANGE = (-1.0, 1.0)
N_COEF = GRID_SIZE + SPLINE_ORDER

# static uniform knot positions (Python floats -> compile-time constants in the kernel)
_H = (GRID_RANGE[1] - GRID_RANGE[0]) / GRID_SIZE
GRID_KNOTS = tuple(
    float((j - SPLINE_ORDER) * _H + GRID_RANGE[0])
    for j in range(GRID_SIZE + 2 * SPLINE_ORDER + 1)
)


def _silu(x):
    return x * (1.0 / (1.0 + jnp.exp(-x)))


def _b_spline_bases(x, knots, spline_order):
    """Cox–de Boor recursion on a STATIC uniform grid, batch-on-lanes layout.

    x: (in, TB) f32.  Returns a list of n_coef arrays of shape (in, TB).

    Uniform-grid simplifications:
      * degree-0: b0_j = (x>=k_j)&(x<k_{j+1}) == ge_j - ge_{j+1}   (knots increasing)
      * level k:  left_j  = (x - k_j)/(k*h) = x/(k*h) - k_j/(k*h)
                  right_j = (k_{j+k+1} - x)/(k*h) = 1 - left_{j+1}
    All constants are Python floats -> VPU mul/sub by immediates only.
    """
    nk = len(knots)
    h = knots[1] - knots[0]
    ge = [jnp.where(x >= knots[j], 1.0, 0.0).astype(jnp.float32) for j in range(nk)]
    bases = [ge[j] - ge[j + 1] for j in range(nk - 1)]
    for k in range(1, spline_order + 1):
        inv = 1.0 / (k * h)
        u = x * inv
        lefts = [u - (knots[j] * inv) for j in range(len(bases))]
        bases = [lefts[j] * bases[j] + (1.0 - lefts[j + 1]) * bases[j + 1]
                 for j in range(len(bases) - 1)]
    return bases


# ----------------------------------------------------------------------------
# Single fused kernel (everything transposed: features on sublanes, batch on lanes):
#   h1 = ReLU( (s1*W1) @ xT + (s1*b1 + t1) )      (MLP Linear 16->32 + BN + ReLU, Dropout=id)
#   h2 = W2 @ h1 + b2                             (MLP Linear 32->24)
#   a  = [silu(h2); B-spline bases(h2)]           (216, TB) sublane concat
#   y  = (s3*[BW|SW]) @ a + t3                    (KANLinear 24->8 base+spline + BN)
# ----------------------------------------------------------------------------
def _fused_kernel(x_ref, w1_ref, b1_ref, w2_ref, b2_ref, wc_ref, t3_ref,
                  o_ref, *, knots, spline_order):
    x = x_ref[...]                                                       # (16, TB)

    # ---- MLP block (BN1 pre-folded into w1/b1) ----
    h1 = jnp.dot(w1_ref[...], x, preferred_element_type=jnp.float32) + b1_ref[...]
    h1 = jnp.maximum(h1, 0.0)                                            # (32, TB)
    # Dropout: identity in eval mode.
    h2 = jnp.dot(w2_ref[...], h1, preferred_element_type=jnp.float32) + b2_ref[...]  # (24, TB)

    # ---- KANLinear: base activation + spline bases, one fused contraction ----
    acts = [_silu(h2)] + _b_spline_bases(h2, knots, spline_order)        # 1+n_coef x (24, TB)
    a = jnp.concatenate(acts, axis=0)                                    # (216, TB), sublane concat
    y = jnp.dot(wc_ref[...], a, preferred_element_type=jnp.float32)      # (8, TB)
    o_ref[...] = y + t3_ref[...]                                         # KAN BN shift (scale folded)


# ----------------------------------------------------------------------------
# One-time parameter preprocessing (hoisted out of the forward path)
# ----------------------------------------------------------------------------
def prepare_params(p):
    def bn_fold(g, b, m, v):
        s = (g / jnp.sqrt(v + BN_EPS)).astype(jnp.float32)
        t = (b - m * s).astype(jnp.float32)
        return s, t

    s1, t1 = bn_fold(p["mlp_bn_g"], p["mlp_bn_b"], p["mlp_bn_m"], p["mlp_bn_v"])
    s3, t3 = bn_fold(p["kan_bn_g"], p["kan_bn_b"], p["kan_bn_m"], p["kan_bn_v"])

    # Fold BN1: relu(s1*(W1 x + b1) + t1) = relu((s1*W1) x + (s1*b1 + t1))
    w1s = (p["mlp_w1"] * s1[:, None]).astype(jnp.float32)                # (32, 16)
    b1s = (p["mlp_b1"] * s1 + t1).astype(jnp.float32).reshape(-1, 1)     # (32, 1)

    w2 = jnp.asarray(p["mlp_w2"], jnp.float32)                           # (24, 32)
    b2 = jnp.asarray(p["mlp_b2"], jnp.float32).reshape(-1, 1)            # (24, 1)

    out_f, in_f, n_coef = p["kan_spline_w"].shape
    scaled = p["kan_spline_w"] * p["kan_spline_scaler"][:, :, None]      # (out, in, n_coef)
    # flatten to (out, n_coef*in): column index = j*in + i (coef-major, in-minor)
    # — matches the in-kernel sublane concat order of the basis blocks.
    sw_flat = jnp.transpose(scaled, (0, 2, 1)).reshape(out_f, n_coef * in_f)
    wc = jnp.concatenate([jnp.asarray(p["kan_base_w"], jnp.float32), sw_flat], axis=1)  # (8, 216)
    wc = (wc * s3[:, None]).astype(jnp.float32)                          # fold BN3 scale

    return dict(w1=w1s, b1=b1s, w2=w2, b2=b2, wc=wc, t3=t3.reshape(-1, 1))


def _choose_tb(batch):
    """Lane tile: multiple of 128, <=1024; >=2 tiles when possible (v7x megacore)."""
    b128 = ((batch + 127) // 128) * 128
    if b128 <= 128:
        return 128
    half = ((b128 // 2 + 127) // 128) * 128
    return min(1024, half)


# ----------------------------------------------------------------------------
# Forward: single pallas_call, batch-on-lanes, batch-tiled, weights resident
# ----------------------------------------------------------------------------
def mlp_kan_forward(x, q, tb=None):
    B, d_in = x.shape
    out_f = q["wc"].shape[0]
    if tb is None:
        tb = _choose_tb(B)
    tb = max(128, ((tb + 127) // 128) * 128)      # lane-aligned tile
    n_tiles = -(-B // tb)
    b_pad = n_tiles * tb

    # batch-on-lanes: tiny wrapper-side transpose (layout plumbing only)
    xt = jnp.transpose(x)                          # (16, B)
    if b_pad != B:
        # padded (zero) columns run through the kernel and are sliced off afterwards;
        # all per-column math is finite for zero input, and eval-BN has no cross-row coupling.
        xt = jnp.pad(xt, ((0, 0), (0, b_pad - B)))

    weight_args = (q["w1"], q["b1"], q["w2"], q["b2"], q["wc"], q["t3"])

    kernel = functools.partial(_fused_kernel, knots=GRID_KNOTS, spline_order=SPLINE_ORDER)

    in_specs = [pl.BlockSpec((d_in, tb), lambda i: (0, i))]
    in_specs += [pl.BlockSpec(w.shape, lambda i: (0, 0)) for w in weight_args]

    out = pl.pallas_call(
        kernel,
        out_shape=jax.ShapeDtypeStruct((out_f, b_pad), jnp.float32),
        grid=(n_tiles,),
        in_specs=in_specs,
        out_specs=pl.BlockSpec((out_f, tb), lambda i: (0, i)),
        compiler_params=pltpu.CompilerParams(
            dimension_semantics=("parallel",),
            vmem_limit_bytes=32 * 1024 * 1024,
        ),
    )(xt, *weight_args)
    return jnp.transpose(out[:, :B])               # (B, 8)


# ----------------------------------------------------------------------------
# pure-JAX reference (mirrors the PyTorch forward, eval mode)
# ----------------------------------------------------------------------------
def ref_forward(x, p):
    y = x @ p["mlp_w1"].T + p["mlp_b1"]
    y = (y - p["mlp_bn_m"]) / jnp.sqrt(p["mlp_bn_v"] + BN_EPS) * p["mlp_bn_g"] + p["mlp_bn_b"]
    y = jnp.maximum(y, 0.0)
    y = y @ p["mlp_w2"].T + p["mlp_b2"]

    in_f = y.shape[1]
    grid = jnp.tile(p["grid"].reshape(1, -1), (in_f, 1))          # (in, G2)
    xg = y[:, :, None]
    bases = ((xg >= grid[None, :, :-1]) & (xg < grid[None, :, 1:])).astype(jnp.float32)
    for k in range(1, SPLINE_ORDER + 1):
        bases = ((xg - grid[None, :, :-(k + 1)])
                 / (grid[None, :, k:-1] - grid[None, :, :-(k + 1)]) * bases[:, :, :-1]
                 + (grid[None, :, k + 1:] - xg)
                 / (grid[None, :, k + 1:] - grid[None, :, 1:-k]) * bases[:, :, 1:])
    scaled = p["kan_spline_w"] * p["kan_spline_scaler"][:, :, None]
    spline_out = bases.reshape(y.shape[0], -1) @ scaled.reshape(scaled.shape[0], -1).T
    base_out = (y * (1.0 / (1.0 + jnp.exp(-y)))) @ p["kan_base_w"].T
    out = base_out + spline_out
    out = (out - p["kan_bn_m"]) / jnp.sqrt(p["kan_bn_v"] + BN_EPS) * p["kan_bn_g"] + p["kan_bn_b"]
    return out


# ----------------------------------------------------------------------------
def make_params(key, layers_hidden=(16, 32, 24, 8)):
    d_in, d_h1, d_h2, d_out = layers_hidden
    n_coef = GRID_SIZE + SPLINE_ORDER
    ks = jax.random.split(key, 16)

    def unif(k, shape, scale):
        return jax.random.uniform(k, shape, jnp.float32, -scale, scale)

    p = {}
    # MLP layer 1 (Linear + BN + ReLU; Dropout=identity in eval)
    p["mlp_w1"] = unif(ks[0], (d_h1, d_in), 1.0 / np.sqrt(d_in))
    p["mlp_b1"] = unif(ks[1], (d_h1,), 1.0 / np.sqrt(d_in))
    p["mlp_bn_g"] = 1.0 + 0.1 * jax.random.normal(ks[2], (d_h1,), jnp.float32)
    p["mlp_bn_b"] = 0.1 * jax.random.normal(ks[3], (d_h1,), jnp.float32)
    p["mlp_bn_m"] = 0.1 * jax.random.normal(ks[4], (d_h1,), jnp.float32)
    p["mlp_bn_v"] = jax.random.uniform(ks[5], (d_h1,), jnp.float32, 0.5, 1.5)
    # MLP layer 2 (final Linear of the MLP block, no BN/ReLU)
    p["mlp_w2"] = unif(ks[6], (d_h2, d_h1), 1.0 / np.sqrt(d_h1))
    p["mlp_b2"] = unif(ks[7], (d_h2,), 1.0 / np.sqrt(d_h1))
    # KANLinear(d_h2 -> d_out)
    h = (GRID_RANGE[1] - GRID_RANGE[0]) / GRID_SIZE
    p["grid"] = (jnp.arange(-SPLINE_ORDER, GRID_SIZE + SPLINE_ORDER + 1, dtype=jnp.float32)
                 * h + GRID_RANGE[0])                               # (G2,)
    p["kan_base_w"] = unif(ks[8], (d_out, d_h2), 1.0 / np.sqrt(d_h2))
    p["kan_spline_w"] = 0.1 * jax.random.normal(ks[9], (d_out, d_h2, n_coef), jnp.float32)
    p["kan_spline_scaler"] = unif(ks[10], (d_out, d_h2), 1.0 / np.sqrt(d_h2))
    p["kan_bn_g"] = 1.0 + 0.1 * jax.random.normal(ks[11], (d_out,), jnp.float32)
    p["kan_bn_b"] = 0.1 * jax.random.normal(ks[12], (d_out,), jnp.float32)
    p["kan_bn_m"] = 0.1 * jax.random.normal(ks[13], (d_out,), jnp.float32)
    p["kan_bn_v"] = jax.random.uniform(ks[14], (d_out,), jnp.float32, 0.5, 1.5)
    return p


if __name__ == "__main__":
    key = jax.random.PRNGKey(0)
    k_par, k_x1, k_x2 = jax.random.split(key, 3)
    layers_hidden = (16, 32, 24, 8)
    params = make_params(k_par, layers_hidden)
    prepared = prepare_params(params)        # one-time weight preprocessing

    # 1) small batch (single 128-lane tile, padded)
    x1 = jax.random.normal(k_x1, (8, layers_hidden[0]), jnp.float32)
    out1 = jax.block_until_ready(mlp_kan_forward(x1, prepared))
    ref1 = jax.block_until_ready(ref_forward(x1, params))
    np.testing.assert_allclose(np.asarray(out1), np.asarray(ref1), rtol=1e-4, atol=1e-4)

    # 2) batch-tiled path: 300 rows, TB=128 -> 3 grid steps with padded tail
    x2 = jax.random.normal(k_x2, (300, layers_hidden[0]), jnp.float32)
    out2 = jax.block_until_ready(mlp_kan_forward(x2, prepared, tb=128))
    ref2 = jax.block_until_ready(ref_forward(x2, params))
    np.testing.assert_allclose(np.asarray(out2), np.asarray(ref2), rtol=1e-4, atol=1e-4)

    print("KERNEL_OK")
</pallas_src>

<mosaic_0001>
module attributes {stable_mosaic.version = 11 : i64} {
  func.func @_fused_kernel(%arg0: i32, %arg1: memref<16x128xf32, #tpu.memory_space<vmem>>, %arg2: memref<32x16xf32, #tpu.memory_space<vmem>>, %arg3: memref<32x1xf32, #tpu.memory_space<vmem>>, %arg4: memref<24x32xf32, #tpu.memory_space<vmem>>, %arg5: memref<24x1xf32, #tpu.memory_space<vmem>>, %arg6: memref<8x216xf32, #tpu.memory_space<vmem>>, %arg7: memref<8x1xf32, #tpu.memory_space<vmem>>, %arg8: memref<8x128xf32, #tpu.memory_space<vmem>>) attributes {dimension_semantics = [#tpu.dimension_semantics<parallel>], iteration_bounds = array<i64: 1>, scalar_prefetch = 0 : i64, scratch_operands = 0 : i64, tpu.core_type = #tpu.core_type<tc>, window_params = [{transform_indices = @transform_0, window_bounds = array<i64: 16, 128>}, {pipeline_mode = #tpu.pipeline_mode<synchronous>, transform_indices = @transform_1, window_bounds = array<i64: 32, 16>}, {pipeline_mode = #tpu.pipeline_mode<synchronous>, transform_indices = @transform_2, window_bounds = array<i64: 32, 1>}, {pipeline_mode = #tpu.pipeline_mode<synchronous>, transform_indices = @transform_3, window_bounds = array<i64: 24, 32>}, {pipeline_mode = #tpu.pipeline_mode<synchronous>, transform_indices = @transform_4, window_bounds = array<i64: 24, 1>}, {pipeline_mode = #tpu.pipeline_mode<synchronous>, transform_indices = @transform_5, window_bounds = array<i64: 8, 216>}, {pipeline_mode = #tpu.pipeline_mode<synchronous>, transform_indices = @transform_6, window_bounds = array<i64: 8, 1>}, {transform_indices = @transform_7, window_bounds = array<i64: 8, 128>}]} {
    %c0 = arith.constant 0 : index
    %c0_0 = arith.constant 0 : index
    %0 = vector.load %arg1[%c0, %c0_0] : memref<16x128xf32, #tpu.memory_space<vmem>>, vector<16x128xf32>
    %c0_1 = arith.constant 0 : index
    %c0_2 = arith.constant 0 : index
    %1 = vector.load %arg2[%c0_1, %c0_2] : memref<32x16xf32, #tpu.memory_space<vmem>>, vector<32x16xf32>
    %cst = arith.constant dense<0.000000e+00> : vector<32x128xf32>
    %2 = tpu.matmul %1, %0, %cst {dimension_numbers = #tpu.dot_dimension_numbers<[1], [0], [0], [1], [0, 0, 1, 1], [], []>} : vector<32x16xf32>, vector<16x128xf32>, vector<32x128xf32> -> vector<32x128xf32>
    %c0_3 = arith.constant 0 : index
    %c0_4 = arith.constant 0 : index
    %3 = vector.load %arg3[%c0_3, %c0_4] : memref<32x1xf32, #tpu.memory_space<vmem>>, vector<32x1xf32>
    %4 = vector.broadcast %3 : vector<32x1xf32> to vector<32x128xf32>
    %5 = arith.addf %2, %4 : vector<32x128xf32>
    %cst_5 = arith.constant 0.000000e+00 : f32
    %6 = vector.broadcast %cst_5 : f32 to vector<32x128xf32>
    %7 = arith.maximumf %5, %6 : vector<32x128xf32>
    %c0_6 = arith.constant 0 : index
    %c0_7 = arith.constant 0 : index
    %8 = vector.load %arg4[%c0_6, %c0_7] : memref<24x32xf32, #tpu.memory_space<vmem>>, vector<24x32xf32>
    %cst_8 = arith.constant dense<0.000000e+00> : vector<24x128xf32>
    %9 = tpu.matmul %8, %7, %cst_8 {dimension_numbers = #tpu.dot_dimension_numbers<[1], [0], [0], [1], [0, 0, 1, 1], [], []>} : vector<24x32xf32>, vector<32x128xf32>, vector<24x128xf32> -> vector<24x128xf32>
    %c0_9 = arith.constant 0 : index
    %c0_10 = arith.constant 0 : index
    %10 = vector.load %arg5[%c0_9, %c0_10] : memref<24x1xf32, #tpu.memory_space<vmem>>, vector<24x1xf32>
    %11 = vector.broadcast %10 : vector<24x1xf32> to vector<24x128xf32>
    %12 = arith.addf %9, %11 : vector<24x128xf32>
    %cst_11 = arith.constant 0.000000e+00 : f32
    %13 = vector.broadcast %cst_11 : f32 to vector<24x128xf32>
    %14 = arith.subf %13, %12 : vector<24x128xf32>
    %15 = math.exp %14 : vector<24x128xf32>
    %cst_12 = arith.constant 1.000000e+00 : f32
    %16 = vector.broadcast %cst_12 : f32 to vector<24x128xf32>
    %17 = arith.addf %16, %15 : vector<24x128xf32>
    %cst_13 = arith.constant 1.000000e+00 : f32
    %18 = vector.broadcast %cst_13 : f32 to vector<24x128xf32>
    %19 = arith.divf %18, %17 : vector<24x128xf32>
    %20 = arith.mulf %12, %19 : vector<24x128xf32>
    %cst_14 = arith.constant -2.200000e+00 : f32
    %21 = vector.broadcast %cst_14 : f32 to vector<24x128xf32>
    %22 = arith.cmpf oge, %12, %21 : vector<24x128xf32>
    %cst_15 = arith.constant 1.000000e+00 : f32
    %cst_16 = arith.constant 0.000000e+00 : f32
    %23 = vector.broadcast %cst_15 : f32 to vector<24x128xf32>
    %24 = vector.broadcast %cst_16 : f32 to vector<24x128xf32>
    %25 = arith.select %22, %23, %24 : vector<24x128xi1>, vector<24x128xf32>
    %cst_17 = arith.constant -1.800000e+00 : f32
    %26 = vector.broadcast %cst_17 : f32 to vector<24x128xf32>
    %27 = arith.cmpf oge, %12, %26 : vector<24x128xf32>
    %cst_18 = arith.constant 1.000000e+00 : f32
    %cst_19 = arith.constant 0.000000e+00 : f32
    %28 = vector.broadcast %cst_18 : f32 to vector<24x128xf32>
    %29 = vector.broadcast %cst_19 : f32 to vector<24x128xf32>
    %30 = arith.select %27, %28, %29 : vector<24x128xi1>, vector<24x128xf32>
    %cst_20 = arith.constant -1.400000e+00 : f32
    %31 = vector.broadcast %cst_20 : f32 to vector<24x128xf32>
    %32 = arith.cmpf oge, %12, %31 : vector<24x128xf32>
    %cst_21 = arith.constant 1.000000e+00 : f32
    %cst_22 = arith.constant 0.000000e+00 : f32
    %33 = vector.broadcast %cst_21 : f32 to vector<24x128xf32>
    %34 = vector.broadcast %cst_22 : f32 to vector<24x128xf32>
    %35 = arith.select %32, %33, %34 : vector<24x128xi1>, vector<24x128xf32>
    %cst_23 = arith.constant -1.000000e+00 : f32
    %36 = vector.broadcast %cst_23 : f32 to vector<24x128xf32>
    %37 = arith.cmpf oge, %12, %36 : vector<24x128xf32>
    %cst_24 = arith.constant 1.000000e+00 : f32
    %cst_25 = arith.constant 0.000000e+00 : f32
    %38 = vector.broadcast %cst_24 : f32 to vector<24x128xf32>
    %39 = vector.broadcast %cst_25 : f32 to vector<24x128xf32>
    %40 = arith.select %37, %38, %39 : vector<24x128xi1>, vector<24x128xf32>
    %cst_26 = arith.constant -6.000000e-01 : f32
    %41 = vector.broadcast %cst_26 : f32 to vector<24x128xf32>
    %42 = arith.cmpf oge, %12, %41 : vector<24x128xf32>
    %cst_27 = arith.constant 1.000000e+00 : f32
    %cst_28 = arith.constant 0.000000e+00 : f32
    %43 = vector.broadcast %cst_27 : f32 to vector<24x128xf32>
    %44 = vector.broadcast %cst_28 : f32 to vector<24x128xf32>
    %45 = arith.select %42, %43, %44 : vector<24x128xi1>, vector<24x128xf32>
    %cst_29 = arith.constant -2.000000e-01 : f32
    %46 = vector.broadcast %cst_29 : f32 to vector<24x128xf32>
    %47 = arith.cmpf oge, %12, %46 : vector<24x128xf32>
    %cst_30 = arith.constant 1.000000e+00 : f32
    %cst_31 = arith.constant 0.000000e+00 : f32
    %48 = vector.broadcast %cst_30 : f32 to vector<24x128xf32>
    %49 = vector.broadcast %cst_31 : f32 to vector<24x128xf32>
    %50 = arith.select %47, %48, %49 : vector<24x128xi1>, vector<24x128xf32>
    %cst_32 = arith.constant 2.000000e-01 : f32
    %51 = vector.broadcast %cst_32 : f32 to vector<24x128xf32>
    %52 = arith.cmpf oge, %12, %51 : vector<24x128xf32>
    %cst_33 = arith.constant 1.000000e+00 : f32
    %cst_34 = arith.constant 0.000000e+00 : f32
    %53 = vector.broadcast %cst_33 : f32 to vector<24x128xf32>
    %54 = vector.broadcast %cst_34 : f32 to vector<24x128xf32>
    %55 = arith.select %52, %53, %54 : vector<24x128xi1>, vector<24x128xf32>
    %cst_35 = arith.constant 6.000000e-01 : f32
    %56 = vector.broadcast %cst_35 : f32 to vector<24x128xf32>
    %57 = arith.cmpf oge, %12, %56 : vector<24x128xf32>
    %cst_36 = arith.constant 1.000000e+00 : f32
    %cst_37 = arith.constant 0.000000e+00 : f32
    %58 = vector.broadcast %cst_36 : f32 to vector<24x128xf32>
    %59 = vector.broadcast %cst_37 : f32 to vector<24x128xf32>
    %60 = arith.select %57, %58, %59 : vector<24x128xi1>, vector<24x128xf32>
    %cst_38 = arith.constant 1.000000e+00 : f32
    %61 = vector.broadcast %cst_38 : f32 to vector<24x128xf32>
    %62 = arith.cmpf oge, %12, %61 : vector<24x128xf32>
    %cst_39 = arith.constant 1.000000e+00 : f32
    %cst_40 = arith.constant 0.000000e+00 : f32
    %63 = vector.broadcast %cst_39 : f32 to vector<24x128xf32>
    %64 = vector.broadcast %cst_40 : f32 to vector<24x128xf32>
    %65 = arith.select %62, %63, %64 : vector<24x128xi1>, vector<24x128xf32>
    %cst_41 = arith.constant 1.400000e+00 : f32
    %66 = vector.broadcast %cst_41 : f32 to vector<24x128xf32>
    %67 = arith.cmpf oge, %12, %66 : vector<24x128xf32>
    %cst_42 = arith.constant 1.000000e+00 : f32
    %cst_43 = arith.constant 0.000000e+00 : f32
    %68 = vector.broadcast %cst_42 : f32 to vector<24x128xf32>
    %69 = vector.broadcast %cst_43 : f32 to vector<24x128xf32>
    %70 = arith.select %67, %68, %69 : vector<24x128xi1>, vector<24x128xf32>
    %cst_44 = arith.constant 1.800000e+00 : f32
    %71 = vector.broadcast %cst_44 : f32 to vector<24x128xf32>
    %72 = arith.cmpf oge, %12, %71 : vector<24x128xf32>
    %cst_45 = arith.constant 1.000000e+00 : f32
    %cst_46 = arith.constant 0.000000e+00 : f32
    %73 = vector.broadcast %cst_45 : f32 to vector<24x128xf32>
    %74 = vector.broadcast %cst_46 : f32 to vector<24x128xf32>
    %75 = arith.select %72, %73, %74 : vector<24x128xi1>, vector<24x128xf32>
    %cst_47 = arith.constant 2.200000e+00 : f32
    %76 = vector.broadcast %cst_47 : f32 to vector<24x128xf32>
    %77 = arith.cmpf oge, %12, %76 : vector<24x128xf32>
    %cst_48 = arith.constant 1.000000e+00 : f32
    %cst_49 = arith.constant 0.000000e+00 : f32
    %78 = vector.broadcast %cst_48 : f32 to vector<24x128xf32>
    %79 = vector.broadcast %cst_49 : f32 to vector<24x128xf32>
    %80 = arith.select %77, %78, %79 : vector<24x128xi1>, vector<24x128xf32>
    %81 = arith.subf %25, %30 : vector<24x128xf32>
    %82 = arith.subf %30, %35 : vector<24x128xf32>
    %83 = arith.subf %35, %40 : vector<24x128xf32>
    %84 = arith.subf %40, %45 : vector<24x128xf32>
    %85 = arith.subf %45, %50 : vector<24x128xf32>
    %86 = arith.subf %50, %55 : vector<24x128xf32>
    %87 = arith.subf %55, %60 : vector<24x128xf32>
    %88 = arith.subf %60, %65 : vector<24x128xf32>
    %89 = arith.subf %65, %70 : vector<24x128xf32>
    %90 = arith.subf %70, %75 : vector<24x128xf32>
    %91 = arith.subf %75, %80 : vector<24x128xf32>
    %cst_50 = arith.constant 2.500000e+00 : f32
    %92 = vector.broadcast %cst_50 : f32 to vector<24x128xf32>
    %93 = arith.mulf %12, %92 : vector<24x128xf32>
    %cst_51 = arith.constant -5.500000e+00 : f32
    %94 = vector.broadcast %cst_51 : f32 to vector<24x128xf32>
    %95 = arith.subf %93, %94 : vector<24x128xf32>
    %cst_52 = arith.constant -4.500000e+00 : f32
    %96 = vector.broadcast %cst_52 : f32 to vector<24x128xf32>
    %97 = arith.subf %93, %96 : vector<24x128xf32>
    %cst_53 = arith.constant -3.500000e+00 : f32
    %98 = vector.broadcast %cst_53 : f32 to vector<24x128xf32>
    %99 = arith.subf %93, %98 : vector<24x128xf32>
    %cst_54 = arith.constant -2.500000e+00 : f32
    %100 = vector.broadcast %cst_54 : f32 to vector<24x128xf32>
    %101 = arith.subf %93, %100 : vector<24x128xf32>
    %cst_55 = arith.constant -1.500000e+00 : f32
    %102 = vector.broadcast %cst_55 : f32 to vector<24x128xf32>
    %103 = arith.subf %93, %102 : vector<24x128xf32>
    %cst_56 = arith.constant -5.000000e-01 : f32
    %104 = vector.broadcast %cst_56 : f32 to vector<24x128xf32>
    %105 = arith.subf %93, %104 : vector<24x128xf32>
    %cst_57 = arith.constant 5.000000e-01 : f32
    %106 = vector.broadcast %cst_57 : f32 to vector<24x128xf32>
    %107 = arith.subf %93, %106 : vector<24x128xf32>
    %cst_58 = arith.constant 1.500000e+00 : f32
    %108 = vector.broadcast %cst_58 : f32 to vector<24x128xf32>
    %109 = arith.subf %93, %108 : vector<24x128xf32>
    %cst_59 = arith.constant 2.500000e+00 : f32
    %110 = vector.broadcast %cst_59 : f32 to vector<24x128xf32>
    %111 = arith.subf %93, %110 : vector<24x128xf32>
    %cst_60 = arith.constant 3.500000e+00 : f32
    %112 = vector.broadcast %cst_60 : f32 to vector<24x128xf32>
    %113 = arith.subf %93, %112 : vector<24x128xf32>
    %cst_61 = arith.constant 4.500000e+00 : f32
    %114 = vector.broadcast %cst_61 : f32 to vector<24x128xf32>
    %115 = arith.subf %93, %114 : vector<24x128xf32>
    %116 = arith.mulf %95, %81 : vector<24x128xf32>
    %cst_62 = arith.constant 1.000000e+00 : f32
    %117 = vector.broadcast %cst_62 : f32 to vector<24x128xf32>
    %118 = arith.subf %117, %97 : vector<24x128xf32>
    %119 = arith.mulf %118, %82 : vector<24x128xf32>
    %120 = arith.addf %116, %119 : vector<24x128xf32>
    %121 = arith.mulf %97, %82 : vector<24x128xf32>
    %cst_63 = arith.constant 1.000000e+00 : f32
    %122 = vector.broadcast %cst_63 : f32 to vector<24x128xf32>
    %123 = arith.subf %122, %99 : vector<24x128xf32>
    %124 = arith.mulf %123, %83 : vector<24x128xf32>
    %125 = arith.addf %121, %124 : vector<24x128xf32>
    %126 = arith.mulf %99, %83 : vector<24x128xf32>
    %cst_64 = arith.constant 1.000000e+00 : f32
    %127 = vector.broadcast %cst_64 : f32 to vector<24x128xf32>
    %128 = arith.subf %127, %101 : vector<24x128xf32>
    %129 = arith.mulf %128, %84 : vector<24x128xf32>
    %130 = arith.addf %126, %129 : vector<24x128xf32>
    %131 = arith.mulf %101, %84 : vector<24x128xf32>
    %cst_65 = arith.constant 1.000000e+00 : f32
    %132 = vector.broadcast %cst_65 : f32 to vector<24x128xf32>
    %133 = arith.subf %132, %103 : vector<24x128xf32>
    %134 = arith.mulf %133, %85 : vector<24x128xf32>
    %135 = arith.addf %131, %134 : vector<24x128xf32>
    %136 = arith.mulf %103, %85 : vector<24x128xf32>
    %cst_66 = arith.constant 1.000000e+00 : f32
    %137 = vector.broadcast %cst_66 : f32 to vector<24x128xf32>
    %138 = arith.subf %137, %105 : vector<24x128xf32>
    %139 = arith.mulf %138, %86 : vector<24x128xf32>
    %140 = arith.addf %136, %139 : vector<24x128xf32>
    %141 = arith.mulf %105, %86 : vector<24x128xf32>
    %cst_67 = arith.constant 1.000000e+00 : f32
    %142 = vector.broadcast %cst_67 : f32 to vector<24x128xf32>
    %143 = arith.subf %142, %107 : vector<24x128xf32>
    %144 = arith.mulf %143, %87 : vector<24x128xf32>
    %145 = arith.addf %141, %144 : vector<24x128xf32>
    %146 = arith.mulf %107, %87 : vector<24x128xf32>
    %cst_68 = arith.constant 1.000000e+00 : f32
    %147 = vector.broadcast %cst_68 : f32 to vector<24x128xf32>
    %148 = arith.subf %147, %109 : vector<24x128xf32>
    %149 = arith.mulf %148, %88 : vector<24x128xf32>
    %150 = arith.addf %146, %149 : vector<24x128xf32>
    %151 = arith.mulf %109, %88 : vector<24x128xf32>
    %cst_69 = arith.constant 1.000000e+00 : f32
    %152 = vector.broadcast %cst_69 : f32 to vector<24x128xf32>
    %153 = arith.subf %152, %111 : vector<24x128xf32>
    %154 = arith.mulf %153, %89 : vector<24x128xf32>
    %155 = arith.addf %151, %154 : vector<24x128xf32>
    %156 = arith.mulf %111, %89 : vector<24x128xf32>
    %cst_70 = arith.constant 1.000000e+00 : f32
    %157 = vector.broadcast %cst_70 : f32 to vector<24x128xf32>
    %158 = arith.subf %157, %113 : vector<24x128xf32>
    %159 = arith.mulf %158, %90 : vector<24x128xf32>
    %160 = arith.addf %156, %159 : vector<24x128xf32>
    %161 = arith.mulf %113, %90 : vector<24x128xf32>
    %cst_71 = arith.constant 1.000000e+00 : f32
    %162 = vector.broadcast %cst_71 : f32 to vector<24x128xf32>
    %163 = arith.subf %162, %115 : vector<24x128xf32>
    %164 = arith.mulf %163, %91 : vector<24x128xf32>
    %165 = arith.addf %161, %164 : vector<24x128xf32>
    %cst_72 = arith.constant 1.250000e+00 : f32
    %166 = vector.broadcast %cst_72 : f32 to vector<24x128xf32>
    %167 = arith.mulf %12, %166 : vector<24x128xf32>
    %cst_73 = arith.constant -2.750000e+00 : f32
    %168 = vector.broadcast %cst_73 : f32 to vector<24x128xf32>
    %169 = arith.subf %167, %168 : vector<24x128xf32>
    %cst_74 = arith.constant -2.250000e+00 : f32
    %170 = vector.broadcast %cst_74 : f32 to vector<24x128xf32>
    %171 = arith.subf %167, %170 : vector<24x128xf32>
    %cst_75 = arith.constant -1.750000e+00 : f32
    %172 = vector.broadcast %cst_75 : f32 to vector<24x128xf32>
    %173 = arith.subf %167, %172 : vector<24x128xf32>
    %cst_76 = arith.constant -1.250000e+00 : f32
    %174 = vector.broadcast %cst_76 : f32 to vector<24x128xf32>
    %175 = arith.subf %167, %174 : vector<24x128xf32>
    %cst_77 = arith.constant -7.500000e-01 : f32
    %176 = vector.broadcast %cst_77 : f32 to vector<24x128xf32>
    %177 = arith.subf %167, %176 : vector<24x128xf32>
    %cst_78 = arith.constant -2.500000e-01 : f32
    %178 = vector.broadcast %cst_78 : f32 to vector<24x128xf32>
    %179 = arith.subf %167, %178 : vector<24x128xf32>
    %cst_79 = arith.constant 2.500000e-01 : f32
    %180 = vector.broadcast %cst_79 : f32 to vector<24x128xf32>
    %181 = arith.subf %167, %180 : vector<24x128xf32>
    %cst_80 = arith.constant 7.500000e-01 : f32
    %182 = vector.broadcast %cst_80 : f32 to vector<24x128xf32>
    %183 = arith.subf %167, %182 : vector<24x128xf32>
    %cst_81 = arith.constant 1.250000e+00 : f32
    %184 = vector.broadcast %cst_81 : f32 to vector<24x128xf32>
    %185 = arith.subf %167, %184 : vector<24x128xf32>
    %cst_82 = arith.constant 1.750000e+00 : f32
    %186 = vector.broadcast %cst_82 : f32 to vector<24x128xf32>
    %187 = arith.subf %167, %186 : vector<24x128xf32>
    %188 = arith.mulf %169, %120 : vector<24x128xf32>
    %cst_83 = arith.constant 1.000000e+00 : f32
    %189 = vector.broadcast %cst_83 : f32 to vector<24x128xf32>
    %190 = arith.subf %189, %171 : vector<24x128xf32>
    %191 = arith.mulf %190, %125 : vector<24x128xf32>
    %192 = arith.addf %188, %191 : vector<24x128xf32>
    %193 = arith.mulf %171, %125 : vector<24x128xf32>
    %cst_84 = arith.constant 1.000000e+00 : f32
    %194 = vector.broadcast %cst_84 : f32 to vector<24x128xf32>
    %195 = arith.subf %194, %173 : vector<24x128xf32>
    %196 = arith.mulf %195, %130 : vector<24x128xf32>
    %197 = arith.addf %193, %196 : vector<24x128xf32>
    %198 = arith.mulf %173, %130 : vector<24x128xf32>
    %cst_85 = arith.constant 1.000000e+00 : f32
    %199 = vector.broadcast %cst_85 : f32 to vector<24x128xf32>
    %200 = arith.subf %199, %175 : vector<24x128xf32>
    %201 = arith.mulf %200, %135 : vector<24x128xf32>
    %202 = arith.addf %198, %201 : vector<24x128xf32>
    %203 = arith.mulf %175, %135 : vector<24x128xf32>
    %cst_86 = arith.constant 1.000000e+00 : f32
    %204 = vector.broadcast %cst_86 : f32 to vector<24x128xf32>
    %205 = arith.subf %204, %177 : vector<24x128xf32>
    %206 = arith.mulf %205, %140 : vector<24x128xf32>
    %207 = arith.addf %203, %206 : vector<24x128xf32>
    %208 = arith.mulf %177, %140 : vector<24x128xf32>
    %cst_87 = arith.constant 1.000000e+00 : f32
    %209 = vector.broadcast %cst_87 : f32 to vector<24x128xf32>
    %210 = arith.subf %209, %179 : vector<24x128xf32>
    %211 = arith.mulf %210, %145 : vector<24x128xf32>
    %212 = arith.addf %208, %211 : vector<24x128xf32>
    %213 = arith.mulf %179, %145 : vector<24x128xf32>
    %cst_88 = arith.constant 1.000000e+00 : f32
    %214 = vector.broadcast %cst_88 : f32 to vector<24x128xf32>
    %215 = arith.subf %214, %181 : vector<24x128xf32>
    %216 = arith.mulf %215, %150 : vector<24x128xf32>
    %217 = arith.addf %213, %216 : vector<24x128xf32>
    %218 = arith.mulf %181, %150 : vector<24x128xf32>
    %cst_89 = arith.constant 1.000000e+00 : f32
    %219 = vector.broadcast %cst_89 : f32 to vector<24x128xf32>
    %220 = arith.subf %219, %183 : vector<24x128xf32>
    %221 = arith.mulf %220, %155 : vector<24x128xf32>
    %222 = arith.addf %218, %221 : vector<24x128xf32>
    %223 = arith.mulf %183, %155 : vector<24x128xf32>
    %cst_90 = arith.constant 1.000000e+00 : f32
    %224 = vector.broadcast %cst_90 : f32 to vector<24x128xf32>
    %225 = arith.subf %224, %185 : vector<24x128xf32>
    %226 = arith.mulf %225, %160 : vector<24x128xf32>
    %227 = arith.addf %223, %226 : vector<24x128xf32>
    %228 = arith.mulf %185, %160 : vector<24x128xf32>
    %cst_91 = arith.constant 1.000000e+00 : f32
    %229 = vector.broadcast %cst_91 : f32 to vector<24x128xf32>
    %230 = arith.subf %229, %187 : vector<24x128xf32>
    %231 = arith.mulf %230, %165 : vector<24x128xf32>
    %232 = arith.addf %228, %231 : vector<24x128xf32>
    %cst_92 = arith.constant 0.833333313 : f32
    %233 = vector.broadcast %cst_92 : f32 to vector<24x128xf32>
    %234 = arith.mulf %12, %233 : vector<24x128xf32>
    %cst_93 = arith.constant -1.83333337 : f32
    %235 = vector.broadcast %cst_93 : f32 to vector<24x128xf32>
    %236 = arith.subf %234, %235 : vector<24x128xf32>
    %cst_94 = arith.constant -1.500000e+00 : f32
    %237 = vector.broadcast %cst_94 : f32 to vector<24x128xf32>
    %238 = arith.subf %234, %237 : vector<24x128xf32>
    %cst_95 = arith.constant -1.16666663 : f32
    %239 = vector.broadcast %cst_95 : f32 to vector<24x128xf32>
    %240 = arith.subf %234, %239 : vector<24x128xf32>
    %cst_96 = arith.constant -0.833333313 : f32
    %241 = vector.broadcast %cst_96 : f32 to vector<24x128xf32>
    %242 = arith.subf %234, %241 : vector<24x128xf32>
    %cst_97 = arith.constant -5.000000e-01 : f32
    %243 = vector.broadcast %cst_97 : f32 to vector<24x128xf32>
    %244 = arith.subf %234, %243 : vector<24x128xf32>
    %cst_98 = arith.constant -0.166666672 : f32
    %245 = vector.broadcast %cst_98 : f32 to vector<24x128xf32>
    %246 = arith.subf %234, %245 : vector<24x128xf32>
    %cst_99 = arith.constant 0.166666672 : f32
    %247 = vector.broadcast %cst_99 : f32 to vector<24x128xf32>
    %248 = arith.subf %234, %247 : vector<24x128xf32>
    %cst_100 = arith.constant 5.000000e-01 : f32
    %249 = vector.broadcast %cst_100 : f32 to vector<24x128xf32>
    %250 = arith.subf %234, %249 : vector<24x128xf32>
    %cst_101 = arith.constant 0.833333313 : f32
    %251 = vector.broadcast %cst_101 : f32 to vector<24x128xf32>
    %252 = arith.subf %234, %251 : vector<24x128xf32>
    %253 = arith.mulf %236, %192 : vector<24x128xf32>
    %cst_102 = arith.constant 1.000000e+00 : f32
    %254 = vector.broadcast %cst_102 : f32 to vector<24x128xf32>
    %255 = arith.subf %254, %238 : vector<24x128xf32>
    %256 = arith.mulf %255, %197 : vector<24x128xf32>
    %257 = arith.addf %253, %256 : vector<24x128xf32>
    %258 = arith.mulf %238, %197 : vector<24x128xf32>
    %cst_103 = arith.constant 1.000000e+00 : f32
    %259 = vector.broadcast %cst_103 : f32 to vector<24x128xf32>
    %260 = arith.subf %259, %240 : vector<24x128xf32>
    %261 = arith.mulf %260, %202 : vector<24x128xf32>
    %262 = arith.addf %258, %261 : vector<24x128xf32>
    %263 = arith.mulf %240, %202 : vector<24x128xf32>
    %cst_104 = arith.constant 1.000000e+00 : f32
    %264 = vector.broadcast %cst_104 : f32 to vector<24x128xf32>
    %265 = arith.subf %264, %242 : vector<24x128xf32>
    %266 = arith.mulf %265, %207 : vector<24x128xf32>
    %267 = arith.addf %263, %266 : vector<24x128xf32>
    %268 = arith.mulf %242, %207 : vector<24x128xf32>
    %cst_105 = arith.constant 1.000000e+00 : f32
    %269 = vector.broadcast %cst_105 : f32 to vector<24x128xf32>
    %270 = arith.subf %269, %244 : vector<24x128xf32>
    %271 = arith.mulf %270, %212 : vector<24x128xf32>
    %272 = arith.addf %268, %271 : vector<24x128xf32>
    %273 = arith.mulf %244, %212 : vector<24x128xf32>
    %cst_106 = arith.constant 1.000000e+00 : f32
    %274 = vector.broadcast %cst_106 : f32 to vector<24x128xf32>
    %275 = arith.subf %274, %246 : vector<24x128xf32>
    %276 = arith.mulf %275, %217 : vector<24x128xf32>
    %277 = arith.addf %273, %276 : vector<24x128xf32>
    %278 = arith.mulf %246, %217 : vector<24x128xf32>
    %cst_107 = arith.constant 1.000000e+00 : f32
    %279 = vector.broadcast %cst_107 : f32 to vector<24x128xf32>
    %280 = arith.subf %279, %248 : vector<24x128xf32>
    %281 = arith.mulf %280, %222 : vector<24x128xf32>
    %282 = arith.addf %278, %281 : vector<24x128xf32>
    %283 = arith.mulf %248, %222 : vector<24x128xf32>
    %cst_108 = arith.constant 1.000000e+00 : f32
    %284 = vector.broadcast %cst_108 : f32 to vector<24x128xf32>
    %285 = arith.subf %284, %250 : vector<24x128xf32>
    %286 = arith.mulf %285, %227 : vector<24x128xf32>
    %287 = arith.addf %283, %286 : vector<24x128xf32>
    %288 = arith.mulf %250, %227 : vector<24x128xf32>
    %cst_109 = arith.constant 1.000000e+00 : f32
    %289 = vector.broadcast %cst_109 : f32 to vector<24x128xf32>
    %290 = arith.subf %289, %252 : vector<24x128xf32>
    %291 = arith.mulf %290, %232 : vector<24x128xf32>
    %292 = arith.addf %288, %291 : vector<24x128xf32>
    %293 = tpu.concatenate %20, %257, %262, %267, %272, %277, %282, %287, %292 in 0 : vector<24x128xf32>, vector<24x128xf32>, vector<24x128xf32>, vector<24x128xf32>, vector<24x128xf32>, vector<24x128xf32>, vector<24x128xf32>, vector<24x128xf32>, vector<24x128xf32> -> vector<216x128xf32>
    %c0_110 = arith.constant 0 : index
    %c0_111 = arith.constant 0 : index
    %294 = vector.load %arg6[%c0_110, %c0_111] : memref<8x216xf32, #tpu.memory_space<vmem>>, vector<8x216xf32>
    %cst_112 = arith.constant dense<0.000000e+00> : vector<8x128xf32>
    %295 = tpu.matmul %294, %293, %cst_112 {dimension_numbers = #tpu.dot_dimension_numbers<[1], [0], [0], [1], [0, 0, 1, 1], [], []>} : vector<8x216xf32>, vector<216x128xf32>, vector<8x128xf32> -> vector<8x128xf32>
    %c0_113 = arith.constant 0 : index
    %c0_114 = arith.constant 0 : index
    %296 = vector.load %arg7[%c0_113, %c0_114] : memref<8x1xf32, #tpu.memory_space<vmem>>, vector<8x1xf32>
    %297 = vector.broadcast %296 : vector<8x1xf32> to vector<8x128xf32>
    %298 = arith.addf %295, %297 : vector<8x128xf32>
    %c0_115 = arith.constant 0 : index
    %c0_116 = arith.constant 0 : index
    %299 = vector.load %arg8[%c0_115, %c0_116] : memref<8x128xf32, #tpu.memory_space<vmem>>, vector<8x128xf32>
    tpu.vector_store %arg8[%c0_115, %c0_116], %298 {strides = array<i32>} : memref<8x128xf32, #tpu.memory_space<vmem>>, vector<8x128xf32>,
    return
  }
  func.func @transform_0(%arg0: i32) -> (i32, i32) {
    %c0_i32 = arith.constant 0 : i32
    %c0_i32_0 = arith.constant 0 : i32
    return %c0_i32, %arg0 : i32, i32
  }
  func.func @transform_1(%arg0: i32) -> (i32, i32) {
    %c0_i32 = arith.constant 0 : i32
    %c0_i32_0 = arith.constant 0 : i32
    %c0_i32_1 = arith.constant 0 : i32
    return %c0_i32, %c0_i32_0 : i32, i32
  }
  func.func @transform_2(%arg0: i32) -> (i32, i32) {
    %c0_i32 = arith.constant 0 : i32
    %c0_i32_0 = arith.constant 0 : i32
    %c0_i32_1 = arith.constant 0 : i32
    return %c0_i32, %c0_i32_0 : i32, i32
  }
  func.func @transform_3(%arg0: i32) -> (i32, i32) {
    %c0_i32 = arith.constant 0 : i32
    %c0_i32_0 = arith.constant 0 : i32
    %c0_i32_1 = arith.constant 0 : i32
    return %c0_i32, %c0_i32_0 : i32, i32
  }
  func.func @transform_4(%arg0: i32) -> (i32, i32) {
    %c0_i32 = arith.constant 0 : i32
    %c0_i32_0 = arith.constant 0 : i32
    %c0_i32_1 = arith.constant 0 : i32
    return %c0_i32, %c0_i32_0 : i32, i32
  }
  func.func @transform_5(%arg0: i32) -> (i32, i32) {
    %c0_i32 = arith.constant 0 : i32
    %c0_i32_0 = arith.constant 0 : i32
    %c0_i32_1 = arith.constant 0 : i32
    return %c0_i32, %c0_i32_0 : i32, i32
  }
  func.func @transform_6(%arg0: i32) -> (i32, i32) {
    %c0_i32 = arith.constant 0 : i32
    %c0_i32_0 = arith.constant 0 : i32
    %c0_i32_1 = arith.constant 0 : i32
    return %c0_i32, %c0_i32_0 : i32, i32
  }
  func.func @transform_7(%arg0: i32) -> (i32, i32) {
    %c0_i32 = arith.constant 0 : i32
    %c0_i32_0 = arith.constant 0 : i32
    return %c0_i32, %arg0 : i32, i32
  }
}

</mosaic_0001>

<bundles_post_ra>
// kernel: tpu_custom_call.1
= control target key start
LH: loop header
LB: loop body
LE: loop exit
PB: predicated region body
PF: predicated region fallthrough
CT: control target
= control target key end

     0   :  { %vm57_vm0 = vcmask 130048   ;;  %v1094_v4 = vmov 0   ;;  %s1813_s0 = inlined_call_operand.vmem [shape: f32[16,128], index: 0, kind: input, shape index: {}]   ;;  %s1814_s1 = inlined_call_operand.vmem [shape: f32[32,16], index: 1, kind: input, shape index: {}]   ;;  %s1815_s2 = inlined_call_operand.vmem [shape: f32[32,1], index: 2, kind: input, shape index: {}]   ;;  %s1816_s3 = inlined_call_operand.vmem [shape: f32[24,32], index: 3, kind: input, shape index: {}]   ;;  %s1817_s4 = inlined_call_operand.vmem [shape: f32[24,1], index: 4, kind: input, shape index: {}]   ;;  %s1818_s5 = inlined_call_operand.vmem [shape: f32[8,216], index: 5, kind: input, shape index: {}]   ;;  %s1819_s6 = inlined_call_operand.vmem [shape: f32[8,1], index: 6, kind: input, shape index: {}]   ;;  %s1820_s7 = inlined_call_operand.hbm [shape: f32[8,128], index: 7, kind: output, shape index: {}]  }
   0x1   :  { %v28_v0 = vld [vmem:[%s1813_s0 + $0x8] sm:$0xff]  ;;  %v27_v1 = vld [vmem:[%s1813_s0] sm:$0xff]  ;;  %1058 = vset.pattern.permute.xlu0 %v1094_v4  ;;  %v36_v5 = vld [vmem:[%s1815_s2 + $0x18] sm:$0xff]  ;;  %1059 = vset.pattern.permute.xlu1 %v1094_v4 }
   0x2   :  { %v29_v2 = vld [vmem:[%s1814_s1] sm:$0xff]  ;;  %1027 = vmatprep.subr.mxu1 %v28_v0  ;;  %v30_v3 = vld [vmem:[%s1814_s1 + $0x8] sm:$0xff]  ;;  %v31_v7 = vld [vmem:[%s1814_s1 + $0x10] sm:$0xff]  ;;  %54 = vperm.xlu0 %1058, %v36_v5  }
   0x3   :  { %1031 = vmatprep.mubr.msk.f32.mxu1 %vm57_vm0, %v29_v2  ;;  %1028 = vmatpush3.msra.mxu1 %v28_v0  ;;  %v34_v6 = vld [vmem:[%s1815_s2 + $0x8] sm:$0xff]  ;;  %v35_v8 = vld [vmem:[%s1815_s2 + $0x10] sm:$0xff] }
   0x4   :  { %1029 = vmatprep.subr.mxu1 %v27_v1 }
   0x5   :  { %1030 = vmatpush3.msra.mxu1 %v27_v1 }
   0x6   :  { %12 = vsyncpa [#allocation3], 0  ;;  %1032 = vmatmul.mubr.msk.f32.vlgmr.msra.gmra.mxu1 %vm57_vm0, %v30_v3  ;;  %44 = vperm.xlu1 %1059, %v34_v6   ;;  %v32_v9 = vld [vmem:[%s1814_s1 + $0x18] sm:$0xff]  ;;  %v33_v10 = vld [vmem:[%s1815_s2] sm:$0xff]  ;;  %v1821_v15 = vmov 0.0   ;;  %vm1096_vm1 = vmmov 0  }
   0x7   :  { %1034 = vmatprep.mubr.msk.f32.mxu1 %vm57_vm0, %v31_v7  ;;  %49 = vperm.xlu0 %1058, %v35_v8   ;;  %v162_v11 = vld [vmem:[%s1817_s4] sm:$0xff]  ;;  %v164_v12 = vld [vmem:[%s1817_s4 + $0x10] sm:$0xff]  ;;  %v163_v13 = vld [vmem:[%s1817_s4 + $0x8] sm:$0xff]  ;;  %vm180_vm2 = vcmask 261120   ;;  %s1097_s10 = smov [#allocation2]  }
   0x8   :  { %v821_v14 = vld [vmem:[%s1819_s6] sm:$0xff]  ;;  %1037 = vmatprep.subr.mxu1 %v1821_v15  ;;  %831 = vmatprep.subr.mxu0 %v1821_v15  ;;  %v160_v33 = vld [vmem:[%s1816_s3 + $0x8] sm:$0xff]  ;;  %v161_v34 = vld [vmem:[%s1816_s3 + $0x10] sm:$0xff]  ;;  %s908_s0 = sshll.u32 %s1097_s10, 4  ;;  %s909_s0 = int_to_ptr.vmem [resolvable:$true] %s908_s0 }
   0x9   :  { %v159_v32 = vld [vmem:[%s1816_s3] sm:$0xff]  ;;  %s1072_s11 = scalar_lea.vmem %s909_s0, 128  ;;  %p1077_p1 = scmp.lt.s32.totalorder %s909_s0, %s909_s0 }
   0xa   :  { %1035 = vmatmul.mubr.msk.f32.gmra.mxu1 %vm57_vm0, %v32_v9  ;;  %39 = vperm.xlu1 %1059, %v33_v10   ;;  %p1073_p0 = scmp.ne.s32.totalorder %s909_s0, %s1072_s11  ;;  %p1078_p2 = scmp.lt.s32.totalorder %s1072_s11, %s1072_s11 }
   0xb   :  { %167 = vperm.xlu0 %1058, %v162_v11   ;;  %1045 = vmatprep.mubr.msk.f32.mxu1 %vm1096_vm1, %v1821_v15 }
   0xc   :  { %p1079_p3 = por %p1078_p2, %p1077_p1 }
   0xe   :  { %177 = vperm.xlu1 %1059, %v164_v12   ;;  %p1080_p4 = pnand %p1079_p3, %p1073_p0 }
   0xf   :  { %172 = vperm.xlu0 %1058, %v163_v13  }
  0x12   :  { %824 = vperm.xlu1 %1059, %v821_v14  }
  0x7d   :  { %v55_v16 = vpop.permute.xlu0 %54 }
  0x81   :  { %v45_v18 = vpop.permute.xlu1 %44 }
  0x82   :  { %v50_v22 = vpop.permute.xlu0 %49 }
  0x85   :  { %v40_v27 = vpop.permute.xlu1 %39 }
  0x86   :  { %v168_v35 = vpop.permute.xlu0 %167 }
  0x89   :  { %v178_v50 = vpop.permute.xlu1 %177 }
  0x8a   :  { %v173_v43 = vpop.permute.xlu0 %172 }
  0xc6   :  { %v1033_v17 = vpop.f32.mrf.mxu1 }
  0xc7   :  { %v142_v24 = vadd.f32 %v1033_v17, %v45_v18 }
  0xc8   :  { %v136_v19 = vpop.f32.mrf.mxu1 }
  0xc9   :  { %v137_v28 = vadd.f32 %v136_v19, %v40_v27  ;;  %v156_v30 = vmax.f32 %v142_v24, 0.0 }
  0xca   :  { %v1036_v20 = vpop.f32.mrf.mxu1 }
  0xcb   :  { %v152_v21 = vadd.f32 %v1036_v20, %v55_v16  ;;  %v155_v31 = vmax.f32 %v137_v28, 0.0 }
  0xcc   :  { %v146_v23 = vpop.f32.mrf.mxu1 }
  0xcd   :  { %v158_v25 = vmax.f32 %v152_v21, 0.0  ;;  %v147_v26 = vadd.f32 %v146_v23, %v50_v22 }
  0xcf   :  { %v157_v29 = vmax.f32 %v147_v26, 0.0  ;;  %1038 = vmatpush3.msra.mxu1 %v158_v25 }
  0xd0   :  { %1039 = vmatprep.subr.mxu1 %v1821_v15 }
  0xd1   :  { %1040 = vmatpush3.msra.mxu1 %v157_v29 }
  0xd2   :  { %1041 = vmatprep.subr.mxu1 %v1821_v15 }
  0xd3   :  { %1042 = vmatpush3.msra.mxu1 %v156_v30 }
  0xd4   :  { %1043 = vmatprep.subr.mxu1 %v1821_v15 }
  0xd5   :  { %1044 = vmatpush3.msra.mxu1 %v155_v31 }
  0xd6   :  { %1046 = vmatmul.mubr.msk.f32.vlgmr.msra.gmra.mxu1 %vm180_vm2, %v159_v32 }
  0xd7   :  { %1048 = vmatprep.mubr.msk.f32.mxu1 %vm1096_vm1, %v1821_v15 }
  0xda   :  { %1049 = vmatmul.mubr.msk.f32.gmra.mxu1 %vm180_vm2, %v160_v33 }
  0xdb   :  { %1051 = vmatprep.mubr.msk.f32.mxu1 %vm1096_vm1, %v1821_v15 }
  0xde   :  { %1052 = vmatmul.mubr.msk.f32.gmra.mxu1 %vm180_vm2, %v161_v34 }
 0x196   :  { %v256_v36 = vpop.f32.mrf.mxu1 }
 0x197   :  { %v1204_v37 = vadd.f32 %v256_v36, %v168_v35 }
 0x198   :  { %v1047_v38 = vpop.f32.mrf.mxu1 }
 0x199   :  { %vm309_vm3 = vcmp.ge.f32.partialorder %v1204_v37, -1.0  ;;  %vm315_vm4 = vcmp.ge.f32.partialorder %v1204_v37, -0.6  ;;  %vm321_vm5 = vcmp.ge.f32.partialorder %v1204_v37, -0.2  ;;  %vm339_vm6 = vcmp.ge.f32.partialorder %v1204_v37, 1.0 }
 0x19a   :  { %v261_v39 = vpop.f32.mrf.mxu1  ;;  %v318_v40 = vsel %vm315_vm4, 1.0, %v1821_v15  ;;  %v324_v41 = vsel %vm321_vm5, 1.0, %v1821_v15  ;;  %vm327_vm7 = vcmp.ge.f32.partialorder %v1204_v37, 0.2  ;;  %vm333_vm8 = vcmp.ge.f32.partialorder %v1204_v37, 0.6 }
 0x19b   :  { %v330_v42 = vsel %vm327_vm7, 1.0, %v1821_v15  ;;  %v1216_v45 = vsel %vm309_vm3, 1.0, %v1821_v15  ;;  %v336_v46 = vsel %vm333_vm8, 1.0, %v1821_v15  ;;  %v1220_v47 = vsel %vm339_vm6, 1.0, %v1821_v15 }
 0x19c   :  { %v1050_v44 = vpop.f32.mrf.mxu1  ;;  %v1222_v48 = vadd.f32 %v261_v39, %v173_v43  ;;  %v1224_v49 = vsub.f32 %v318_v40, %v324_v41  ;;  %v378_v52 = vsub.f32 %v324_v41, %v330_v42  ;;  %v1227_v53 = vmul.f32 2.5, %v1204_v37 }
 0x19d   :  { %v1230_v54 = vmul.f32 1.25, %v1204_v37  ;;  %v1233_v55 = vmul.f32 0.8333333, %v1204_v37  ;;  %v1238_v57 = vsub.f32 %v1216_v45, %v318_v40  ;;  %v381_v58 = vsub.f32 %v330_v42, %v336_v46 }
 0x19e   :  { %v266_v51 = vpop.f32.mrf.mxu1  ;;  %v1241_v59 = vsub.f32 %v336_v46, %v1220_v47  ;;  %v1244_v61 = vadd.f32 1.5, %v1227_v53  ;;  %v938_v62 = vadd.f32 0.5, %v1227_v53  ;;  %v941_v63 = vadd.f32 -0.5, %v1227_v53 }
 0x19f   :  { %v1235_v56 = vadd.f32 %v266_v51, %v178_v50  ;;  %v1249_v0 = vadd.f32 -1.5, %v1227_v53  ;;  %v1252_v1 = vadd.f32 0.75, %v1230_v54  ;;  %v971_v2 = vadd.f32 0.25, %v1230_v54 }
 0x1a0   :  { %v1053_v60 = vpop.f32.mrf.mxu1  ;;  %v1256_v3 = vadd.f32 -0.25, %v1230_v54  ;;  %v1259_v4 = vadd.f32 0.5, %v1233_v55  ;;  %vm310_vm9 = vcmp.ge.f32.partialorder %v1222_v48, -1.0  ;;  %vm316_vm10 = vcmp.ge.f32.partialorder %v1222_v48, -0.6 }
 0x1a1   :  { %v471_v5 = vsub.f32 1.0, %v1244_v61  ;;  %v480_v6 = vmul.f32 %v1244_v61, %v1224_v49  ;;  %v483_v7 = vsub.f32 1.0, %v938_v62  ;;  %v492_v8 = vmul.f32 %v938_v62, %v378_v52 }
 0x1a2   :  { %1834 = vst [vmem:[#allocation5_spill] sm:$0xff] %v1256_v3  ;;  %v495_v9 = vsub.f32 1.0, %v941_v63  ;;  %v504_v10 = vmul.f32 %v941_v63, %v381_v58  ;;  %v507_v11 = vsub.f32 1.0, %v1249_v0  ;;  %v636_v14 = vsub.f32 1.0, %v971_v2 }
 0x1a3   :  { %v486_v13 = vmul.f32 %v483_v7, %v378_v52  ;;  %v648_v16 = vsub.f32 1.0, %v1256_v3  ;;  %v1270_v17 = vadd.f32 0.16666667, %v1233_v55  ;;  %vm311_vm11 = vcmp.ge.f32.partialorder %v1235_v56, -1.0 }
 0x1a4   :  { %v498_v18 = vmul.f32 %v495_v9, %v381_v58  ;;  %v510_v19 = vmul.f32 %v507_v11, %v1241_v59  ;;  %v1279_v23 = vsel %vm311_vm11, 1.0, %v1821_v15  ;;  %vm317_vm12 = vcmp.ge.f32.partialorder %v1235_v56, -0.6 }
 0x1a5   :  { %1835 = vst [vmem:[#allocation6_spill] sm:$0xff] %v1270_v17  ;;  %v1275_v21 = vadd.f32 %v486_v13, %v480_v6  ;;  %v774_v22 = vsub.f32 1.0, %v1270_v17  ;;  %v320_v26 = vsel %vm317_vm12, 1.0, %v1821_v15  ;;  %vm323_vm13 = vcmp.ge.f32.partialorder %v1235_v56, -0.2 }
 0x1a6   :  { %v501_v24 = vadd.f32 %v498_v18, %v492_v8  ;;  %v1282_v25 = vadd.f32 %v510_v19, %v504_v10  ;;  %vm322_vm14 = vcmp.ge.f32.partialorder %v1222_v48, -0.2  ;;  %v326_v28 = vsel %vm323_vm13, 1.0, %v1821_v15 }
 0x1a7   :  { %v633_v27 = vmul.f32 %v1252_v1, %v1275_v21  ;;  %vm329_vm15 = vcmp.ge.f32.partialorder %v1235_v56, 0.2  ;;  %vm335_vm0 = vcmp.ge.f32.partialorder %v1235_v56, 0.6  ;;  %v1298_v34 = vsub.f32 %v1279_v23, %v320_v26 }
 0x1a8   :  { %1836 = vst [vmem:[#allocation7_spill] sm:$0xff] %v1282_v25  ;;  %v639_v29 = vmul.f32 %v636_v14, %v501_v24  ;;  %v645_v30 = vmul.f32 %v971_v2, %v501_v24  ;;  %v651_v31 = vmul.f32 %v648_v16, %v1282_v25  ;;  %v332_v32 = vsel %vm329_vm15, 1.0, %v1821_v15 }
 0x1a9   :  { %v1295_v33 = vsel %vm335_vm0, 1.0, %v1821_v15  ;;  %v377_v35 = vsub.f32 %v320_v26, %v326_v28  ;;  %v380_v36 = vsub.f32 %v326_v28, %v332_v32  ;;  %v1308_v41 = vmul.f32 2.5, %v1235_v56 }
 0x1aa   :  { %v1300_v38 = vadd.f32 %v639_v29, %v633_v27  ;;  %v1302_v39 = vadd.f32 %v651_v31, %v645_v30  ;;  %v1305_v40 = vsub.f32 %v332_v32, %v1295_v33  ;;  %v1311_v42 = vmul.f32 1.25, %v1235_v56 }
 0x1ab   :  { %v1314_v43 = vmul.f32 0.8333333, %v1235_v56  ;;  %v1319_v44 = vsel %vm310_vm9, 1.0, %v1821_v15  ;;  %v319_v46 = vsel %vm316_vm10, 1.0, %v1821_v15  ;;  %v1328_v52 = vadd.f32 2.5, %v1308_v41 }
 0x1ac   :  { %1837 = vst [vmem:[#allocation8_spill] sm:$0xff] %v1302_v39  ;;  %v771_v50 = vmul.f32 %v1259_v4, %v1300_v38  ;;  %v777_v51 = vmul.f32 %v774_v22, %v1302_v39  ;;  %v937_v58 = vadd.f32 1.5, %v1308_v41  ;;  %v940_v60 = vadd.f32 0.5, %v1308_v41 }
 0x1ad   :  { %v1333_v62 = vadd.f32 -0.5, %v1308_v41  ;;  %v1336_v63 = vadd.f32 1.25, %v1311_v42  ;;  %v970_v2 = vadd.f32 0.75, %v1311_v42  ;;  %v470_v7 = vmul.f32 %v1328_v52, %v1298_v34 }
 0x1ae   :  { %v780_v6 = vadd.f32 %v777_v51, %v771_v50  ;;  %v473_v8 = vsub.f32 1.0, %v937_v58  ;;  %v482_v9 = vmul.f32 %v937_v58, %v377_v35  ;;  %v485_v10 = vsub.f32 1.0, %v940_v60 }
 0x1af   :  { %v494_v11 = vmul.f32 %v940_v60, %v380_v36  ;;  %v497_v13 = vsub.f32 1.0, %v1333_v62  ;;  %v1343_v14 = vadd.f32 0.25, %v1311_v42  ;;  %v626_v18 = vsub.f32 1.0, %v970_v2 }
 0x1b0   :  { %832 = vmatpush1.msra.mxu0 %v780_v6  ;;  %v476_v16 = vmul.f32 %v473_v8, %v377_v35  ;;  %v1346_v19 = vadd.f32 0.8333333, %v1314_v43  ;;  %v1349_v22 = vadd.f32 0.5, %v1314_v43  ;;  %v488_v24 = vmul.f32 %v485_v10, %v380_v36 }
 0x1b1   :  { %1838 = vst [vmem:[#allocation9_spill] sm:$0xff] %v1343_v14  ;;  %833 = vmatprep.subr.mxu0 %v1821_v15  ;;  %v500_v26 = vmul.f32 %v497_v13, %v1305_v40  ;;  %v638_v27 = vsub.f32 1.0, %v1343_v14  ;;  %v325_v28 = vsel %vm322_vm14, 1.0, %v1821_v15  ;;  %vm328_vm1 = vcmp.ge.f32.partialorder %v1222_v48, 0.2 }
 0x1b2   :  { %1839 = vst [vmem:[#allocation10_spill] sm:$0xff] %v1349_v22  ;;  %v1357_v29 = vadd.f32 %v476_v16, %v470_v7  ;;  %v764_v30 = vsub.f32 1.0, %v1349_v22  ;;  %vm334_vm2 = vcmp.ge.f32.partialorder %v1222_v48, 0.6  ;;  %v491_v31 = vadd.f32 %v488_v24, %v482_v9 }
 0x1b3   :  { %v1362_v32 = vadd.f32 %v500_v26, %v494_v11  ;;  %v331_v35 = vsel %vm328_vm1, 1.0, %v1821_v15  ;;  %v1366_v36 = vsel %vm334_vm2, 1.0, %v1821_v15  ;;  %v1371_v51 = vsub.f32 %v1319_v44, %v319_v46 }
 0x1b4   :  { %v623_v50 = vmul.f32 %v1336_v63, %v1357_v29  ;;  %v376_v58 = vsub.f32 %v319_v46, %v325_v28  ;;  %v379_v60 = vsub.f32 %v325_v28, %v331_v35  ;;  %v629_v6 = vmul.f32 %v626_v18, %v491_v31 }
 0x1b5   :  { %1840 = vst [vmem:[#allocation11_spill] sm:$0xff] %v1362_v32  ;;  %v635_v7 = vmul.f32 %v970_v2, %v491_v31  ;;  %v641_v8 = vmul.f32 %v638_v27, %v1362_v32  ;;  %v1375_v9 = vsub.f32 %v331_v35, %v1366_v36  ;;  %v1378_v10 = vmul.f32 2.5, %v1222_v48 }
 0x1b6   :  { %v1381_v11 = vmul.f32 1.25, %v1222_v48  ;;  %v1384_v13 = vmul.f32 0.8333333, %v1222_v48  ;;  %v1387_v16 = vadd.f32 2.5, %v1227_v53  ;;  %v1389_v46 = vadd.f32 %v629_v6, %v623_v50 }
 0x1b7   :  { %v1391_v2 = vadd.f32 %v641_v8, %v635_v7  ;;  %v474_v18 = vmul.f32 %v471_v5, %v1224_v49  ;;  %v1397_v24 = vadd.f32 1.25, %v1230_v54  ;;  %v1400_v26 = vadd.f32 2.5, %v1378_v10 }
 0x1b8   :  { %v936_v27 = vadd.f32 1.5, %v1378_v10  ;;  %v939_v28 = vadd.f32 0.5, %v1378_v10  ;;  %v1405_v31 = vadd.f32 -0.5, %v1378_v10  ;;  %v761_v35 = vmul.f32 %v1346_v19, %v1389_v46 }
 0x1b9   :  { %1841 = vst [vmem:[#allocation12_spill] sm:$0xff] %v1391_v2  ;;  %v767_v50 = vmul.f32 %v764_v30, %v1391_v2  ;;  %v1411_v49 = vadd.f32 1.25, %v1381_v11  ;;  %v969_v61 = vadd.f32 0.75, %v1381_v11  ;;  %v469_v5 = vmul.f32 %v1400_v26, %v1371_v51 }
 0x1ba   :  { %v472_v6 = vsub.f32 1.0, %v936_v27  ;;  %v481_v7 = vmul.f32 %v936_v27, %v376_v58  ;;  %v484_v8 = vsub.f32 1.0, %v939_v28  ;;  %v493_v12 = vmul.f32 %v939_v28, %v379_v60 }
 0x1bb   :  { %v770_v20 = vadd.f32 %v767_v50, %v761_v35  ;;  %v496_v15 = vsub.f32 1.0, %v1405_v31  ;;  %v1418_v22 = vadd.f32 0.25, %v1381_v11  ;;  %v625_v2 = vsub.f32 1.0, %v969_v61 }
 0x1bc   :  { %v475_v17 = vmul.f32 %v472_v6, %v376_v58  ;;  %v487_v30 = vmul.f32 %v484_v8, %v379_v60  ;;  %v1421_v39 = vadd.f32 0.8333333, %v1384_v13  ;;  %v1426_v27 = vadd.f32 0.5, %v1384_v13 }
 0x1bd   :  { %1842 = vst [vmem:[#allocation13_spill] sm:$0xff] %v1418_v22  ;;  %834 = vmatpush1.msra.mxu0 %v770_v20  ;;  %v499_v14 = vmul.f32 %v496_v15, %v1375_v9  ;;  %v637_v32 = vsub.f32 1.0, %v1418_v22  ;;  %v468_v28 = vmul.f32 %v1387_v16, %v1238_v57  ;;  %v1844_v35 = vmov 0.0  }
 0x1be   :  { %1843 = vst [vmem:[#allocation14_spill] sm:$0xff] %v1426_v27  ;;  %835 = vmatprep.subr.mxu0 %v1844_v35  ;;  %v478_v50 = vadd.f32 %v475_v17, %v469_v5  ;;  %v490_v58 = vadd.f32 %v487_v30, %v481_v7  ;;  %v1845_v60 = vsub.f32 1.0, %v1252_v1  ;;  %v1435_v20 = vadd.f32 0.8333333, %v1233_v55 }
 0x1bf   :  { %v1437_v15 = vadd.f32 %v499_v14, %v493_v12  ;;  %v763_v8 = vsub.f32 1.0, %v1426_v27  ;;  %v1440_v22 = vadd.f32 %v474_v18, %v468_v28  ;;  %v1846_v3 = vsub.f32 1.0, %v1259_v4 }
 0x1c0   :  { %v627_v6 = vmul.f32 %v1845_v60, %v1275_v21  ;;  %v622_v17 = vmul.f32 %v1411_v49, %v478_v50  ;;  %v628_v5 = vmul.f32 %v625_v2, %v490_v58  ;;  %v634_v7 = vmul.f32 %v969_v61, %v490_v58 }
 0x1c1   :  { %v765_v25 = vmul.f32 %v1846_v3, %v1300_v38  ;;  %vm305_vm3 = vcmp.ge.f32.partialorder %v1235_v56, -1.4  ;;  %v640_v1 = vmul.f32 %v637_v32, %v1437_v15  ;;  %v621_v12 = vmul.f32 %v1397_v24, %v1440_v22 }
 0x1c2   :  { %v1451_v21 = vsel %vm305_vm3, 1.0, %v1844_v35  ;;  %v1454_v14 = vadd.f32 3.5, %v1308_v41  ;;  %v631_v18 = vadd.f32 %v628_v5, %v622_v17  ;;  %v461_v4 = vsub.f32 1.0, %v1328_v52 }
 0x1c3   :  { %v1458_v3 = vsub.f32 %v1451_v21, %v1279_v23  ;;  %v1462_v38 = vadd.f32 1.75, %v1311_v42  ;;  %v1464_v32 = vadd.f32 %v640_v1, %v634_v7  ;;  %v630_v2 = vadd.f32 %v627_v6, %v621_v12 }
 0x1c4   :  { %v614_v61 = vsub.f32 1.0, %v1336_v63  ;;  %v1468_v30 = vadd.f32 1.1666666, %v1314_v43  ;;  %v760_v28 = vmul.f32 %v1421_v39, %v631_v18  ;;  %v464_v23 = vmul.f32 %v461_v4, %v1298_v34 }
 0x1c5   :  { %1847 = vst [vmem:[#allocation15_spill] sm:$0xff] %v1464_v32  ;;  %v458_v58 = vmul.f32 %v1454_v14, %v1458_v3  ;;  %v752_v52 = vsub.f32 1.0, %v1346_v19  ;;  %v766_v60 = vmul.f32 %v763_v8, %v1464_v32  ;;  %v759_v17 = vmul.f32 %v1435_v20, %v630_v2 }
 0x1c6   :  { %v617_v6 = vmul.f32 %v614_v61, %v1357_v29  ;;  %vm304_vm4 = vcmp.ge.f32.partialorder %v1222_v48, -1.4  ;;  %v1482_v1 = vadd.f32 3.5, %v1378_v10  ;;  %v460_v8 = vsub.f32 1.0, %v1400_v26 }
 0x1c7   :  { %v467_v63 = vadd.f32 %v464_v23, %v458_v58  ;;  %v755_v5 = vmul.f32 %v752_v52, %v1389_v46  ;;  %v307_v7 = vsel %vm304_vm4, 1.0, %v1844_v35  ;;  %v769_v12 = vadd.f32 %v766_v60, %v760_v28 }
 0x1c8   :  { %v768_v34 = vadd.f32 %v765_v25, %v759_v17  ;;  %v1485_v19 = vsub.f32 %v307_v7, %v1319_v44  ;;  %v1490_v29 = vadd.f32 1.75, %v1381_v11  ;;  %v613_v61 = vsub.f32 1.0, %v1411_v49 }
 0x1c9   :  { %v611_v4 = vmul.f32 %v1462_v38, %v467_v63  ;;  %v1494_v46 = vadd.f32 1.1666666, %v1384_v13  ;;  %836 = vmatpush1.msra.mxu0 %v769_v12  ;;  %v463_v25 = vmul.f32 %v460_v8, %v1371_v51  ;;  %v751_v44 = vsub.f32 1.0, %v1421_v39 }
 0x1ca   :  { %v457_v28 = vmul.f32 %v1482_v1, %v1485_v19  ;;  %vm303_vm5 = vcmp.ge.f32.partialorder %v1204_v37, -1.4  ;;  %837 = vmatprep.subr.mxu0 %v1844_v35  ;;  %v616_v58 = vmul.f32 %v613_v61, %v478_v50  ;;  %v1506_v49 = vadd.f32 3.5, %v1227_v53 }
 0x1cb   :  { %v620_v26 = vadd.f32 %v617_v6, %v611_v4  ;;  %v1503_v23 = vsel %vm303_vm5, 1.0, %v1844_v35  ;;  %838 = vmatpush1.msra.mxu0 %v768_v34  ;;  %v754_v60 = vmul.f32 %v751_v44, %v631_v18  ;;  %v459_v39 = vsub.f32 1.0, %v1387_v16 }
 0x1cc   :  { %v466_v52 = vadd.f32 %v463_v25, %v457_v28  ;;  %v1510_v51 = vsub.f32 %v1503_v23, %v1216_v45  ;;  %839 = vmatprep.subr.mxu0 %v1844_v35  ;;  %v1516_v50 = vadd.f32 1.75, %v1230_v54  ;;  %v612_v6 = vsub.f32 1.0, %v1397_v24 }
 0x1cd   :  { %v749_v17 = vmul.f32 %v1468_v30, %v620_v26  ;;  %v1520_v12 = vadd.f32 1.1666666, %v1233_v55  ;;  %v462_v34 = vmul.f32 %v459_v39, %v1238_v57  ;;  %v750_v16 = vsub.f32 1.0, %v1435_v20 }
 0x1ce   :  { %v610_v18 = vmul.f32 %v1490_v29, %v466_v52  ;;  %v456_v45 = vmul.f32 %v1506_v49, %v1510_v51  ;;  %v615_v4 = vmul.f32 %v612_v6, %v1440_v22  ;;  %vm299_vm6 = vcmp.ge.f32.partialorder %v1235_v56, -1.8 }
 0x1cf   :  { %v758_v8 = vadd.f32 %v755_v5, %v749_v17  ;;  %v1530_v61 = vadd.f32 4.5, %v1308_v41  ;;  %v753_v25 = vmul.f32 %v750_v16, %v630_v2  ;;  %v1533_v44 = vsel %vm299_vm6, 1.0, %v1844_v35 }
 0x1d0   :  { %v619_v24 = vadd.f32 %v616_v58, %v610_v18  ;;  %v465_v28 = vadd.f32 %v462_v34, %v456_v45  ;;  %v1537_v57 = vsub.f32 %v1533_v44, %v1451_v21  ;;  %v449_v20 = vsub.f32 1.0, %v1454_v14 }
 0x1d1   :  { %840 = vmatpush1.msra.mxu0 %v758_v8  ;;  %v1541_v22 = vadd.f32 2.25, %v1311_v42  ;;  %v602_v5 = vsub.f32 1.0, %v1462_v38  ;;  %v1548_v39 = vadd.f32 1.5, %v1314_v43  ;;  %v740_v17 = vsub.f32 1.0, %v1468_v30 }
 0x1d2   :  { %841 = vmatprep.subr.mxu0 %v1844_v35  ;;  %v748_v58 = vmul.f32 %v1494_v46, %v619_v24  ;;  %v609_v2 = vmul.f32 %v1516_v50, %v465_v28  ;;  %v446_v21 = vmul.f32 %v1530_v61, %v1537_v57  ;;  %v452_v14 = vmul.f32 %v449_v20, %v1458_v3 }
 0x1d3   :  { %v605_v6 = vmul.f32 %v602_v5, %v467_v63  ;;  %vm298_vm7 = vcmp.ge.f32.partialorder %v1222_v48, -1.8  ;;  %v743_v45 = vmul.f32 %v740_v17, %v620_v26  ;;  %v1562_v30 = vadd.f32 4.5, %v1378_v10 }
 0x1d4   :  { %v757_v38 = vadd.f32 %v754_v60, %v748_v58  ;;  %v618_v18 = vadd.f32 %v615_v4, %v609_v2  ;;  %v1556_v34 = vsel %vm298_vm7, 1.0, %v1844_v35  ;;  %v455_v16 = vadd.f32 %v452_v14, %v446_v21 }
 0x1d5   :  { %v1559_v8 = vsub.f32 %v1556_v34, %v307_v7  ;;  %v448_v27 = vsub.f32 1.0, %v1482_v1  ;;  %v1567_v63 = vadd.f32 2.25, %v1381_v11  ;;  %v601_v26 = vsub.f32 1.0, %v1490_v29 }
 0x1d6   :  { %842 = vmatpush1.msra.mxu0 %v757_v38  ;;  %v747_v3 = vmul.f32 %v1520_v12, %v618_v18  ;;  %v1571_v60 = vadd.f32 1.5, %v1384_v13  ;;  %v599_v7 = vmul.f32 %v1541_v22, %v455_v16  ;;  %v739_v20 = vsub.f32 1.0, %v1494_v46 }
 0x1d7   :  { %843 = vmatprep.subr.mxu0 %v1844_v35  ;;  %v445_v4 = vmul.f32 %v1562_v30, %v1559_v8  ;;  %v451_v1 = vmul.f32 %v448_v27, %v1485_v19  ;;  %v604_v58 = vmul.f32 %v601_v26, %v466_v52  ;;  %vm297_vm8 = vcmp.ge.f32.partialorder %v1204_v37, -1.8 }
 0x1d8   :  { %v756_v5 = vadd.f32 %v753_v25, %v747_v3  ;;  %v1581_v29 = vadd.f32 4.5, %v1227_v53  ;;  %v608_v2 = vadd.f32 %v605_v6, %v599_v7  ;;  %v742_v21 = vmul.f32 %v739_v20, %v619_v24 }
 0x1d9   :  { %v454_v17 = vadd.f32 %v451_v1, %v445_v4  ;;  %v1584_v14 = vsel %vm297_vm8, 1.0, %v1844_v35  ;;  %v447_v27 = vsub.f32 1.0, %v1506_v49  ;;  %v1592_v19 = vadd.f32 2.25, %v1230_v54 }
 0x1da   :  { %844 = vmatpush1.msra.mxu0 %v756_v5  ;;  %v1588_v38 = vsub.f32 %v1584_v14, %v1503_v23  ;;  %v600_v46 = vsub.f32 1.0, %v1516_v50  ;;  %v737_v52 = vmul.f32 %v1548_v39, %v608_v2  ;;  %v1599_v25 = vadd.f32 1.5, %v1233_v55 }
 0x1db   :  { %845 = vmatprep.subr.mxu0 %v1844_v35  ;;  %v598_v24 = vmul.f32 %v1567_v63, %v454_v17  ;;  %v738_v6 = vsub.f32 1.0, %v1520_v12  ;;  %v450_v49 = vmul.f32 %v447_v27, %v1510_v51  ;;  %vm293_vm9 = vcmp.ge.f32.partialorder %v1235_v56, -2.2 }
 0x1dc   :  { %v444_v23 = vmul.f32 %v1581_v29, %v1588_v38  ;;  %v603_v3 = vmul.f32 %v600_v46, %v465_v28  ;;  %v746_v50 = vadd.f32 %v743_v45, %v737_v52  ;;  %v296_v4 = vsel %vm293_vm9, 1.0, %v1844_v35 }
 0x1dd   :  { %v607_v26 = vadd.f32 %v604_v58, %v598_v24  ;;  %v741_v7 = vmul.f32 %v738_v6, %v618_v18  ;;  %v365_v20 = vsub.f32 %v296_v4, %v1533_v44  ;;  %v925_v5 = vadd.f32 5.5, %v1308_v41 }
 0x1de   :  { %v453_v1 = vadd.f32 %v450_v49, %v444_v23  ;;  %v437_v12 = vsub.f32 1.0, %v1530_v61  ;;  %846 = vmatpush1.msra.mxu0 %v746_v50  ;;  %v958_v51 = vadd.f32 2.75, %v1311_v42  ;;  %v590_v28 = vsub.f32 1.0, %v1541_v22 }
 0x1df   :  { %v736_v32 = vmul.f32 %v1571_v60, %v607_v26  ;;  %v988_v45 = vadd.f32 1.8333334, %v1314_v43  ;;  %847 = vmatprep.subr.mxu0 %v1844_v35  ;;  %v434_v58 = vmul.f32 %v925_v5, %v365_v20  ;;  %v728_v27 = vsub.f32 1.0, %v1548_v39 }
 0x1e0   :  { %v597_v18 = vmul.f32 %v1592_v19, %v453_v1  ;;  %v440_v44 = vmul.f32 %v437_v12, %v1537_v57  ;;  %v593_v61 = vmul.f32 %v590_v28, %v455_v16  ;;  %vm292_vm10 = vcmp.ge.f32.partialorder %v1222_v48, -2.2 }
 0x1e1   :  { %v745_v46 = vadd.f32 %v742_v21, %v736_v32  ;;  %v924_v52 = vadd.f32 5.5, %v1378_v10  ;;  %v731_v22 = vmul.f32 %v728_v27, %v608_v2  ;;  %v295_v23 = vsel %vm292_vm10, 1.0, %v1844_v35 }
 0x1e2   :  { %v606_v24 = vadd.f32 %v603_v3, %v597_v18  ;;  %v443_v6 = vadd.f32 %v440_v44, %v434_v58  ;;  %v364_v49 = vsub.f32 %v295_v23, %v1556_v34  ;;  %v436_v50 = vsub.f32 1.0, %v1562_v30 }
 0x1e3   :  { %848 = vmatpush1.msra.mxu0 %v745_v46  ;;  %v957_v57 = vadd.f32 2.75, %v1381_v11  ;;  %v589_v39 = vsub.f32 1.0, %v1567_v63  ;;  %v987_v21 = vadd.f32 1.8333334, %v1384_v13  ;;  %v727_v2 = vsub.f32 1.0, %v1571_v60 }
 0x1e4   :  { %849 = vmatprep.subr.mxu0 %v1844_v35  ;;  %v735_v32 = vmul.f32 %v1599_v25, %v606_v24  ;;  %v587_v16 = vmul.f32 %v958_v51, %v443_v6  ;;  %v433_v3 = vmul.f32 %v924_v52, %v364_v49  ;;  %v439_v4 = vmul.f32 %v436_v50, %v1559_v8 }
 0x1e5   :  { %v592_v20 = vmul.f32 %v589_v39, %v454_v17  ;;  %vm291_vm11 = vcmp.ge.f32.partialorder %v1204_v37, -2.2  ;;  %v730_v5 = vmul.f32 %v727_v2, %v607_v26  ;;  %vm345_vm12 = vcmp.ge.f32.partialorder %v1204_v37, 1.4 }
 0x1e6   :  { %v744_v34 = vadd.f32 %v741_v7, %v735_v32  ;;  %v596_v30 = vadd.f32 %v593_v61, %v587_v16  ;;  %v294_v63 = vsel %vm291_vm11, 1.0, %v1844_v35  ;;  %v442_v12 = vadd.f32 %v439_v4, %v433_v3 }
 0x1e7   :  { %v363_v51 = vsub.f32 %v294_v63, %v1584_v14  ;;  %v923_v28 = vadd.f32 5.5, %v1227_v53  ;;  %v435_v60 = vsub.f32 1.0, %v1581_v29  ;;  %v956_v8 = vadd.f32 2.75, %v1230_v54 }
 0x1e8   :  { %850 = vmatpush1.msra.mxu0 %v744_v34  ;;  %v725_v18 = vmul.f32 %v988_v45, %v596_v30  ;;  %v588_v17 = vsub.f32 1.0, %v1592_v19  ;;  %v986_v7 = vadd.f32 1.8333334, %v1233_v55  ;;  %v586_v26 = vmul.f32 %v957_v57, %v442_v12 }
 0x1e9   :  { %851 = vmatprep.subr.mxu0 %v1844_v35  ;;  %v432_v58 = vmul.f32 %v923_v28, %v363_v51  ;;  %v438_v44 = vmul.f32 %v435_v60, %v1588_v38  ;;  %v726_v14 = vsub.f32 1.0, %v1599_v25  ;;  %v272_v29 = vsub.f32 0.0, %v1235_v56 }
 0x1ea   :  { %v734_v27 = vadd.f32 %v731_v22, %v725_v18  ;;  %v591_v46 = vmul.f32 %v588_v17, %v453_v1  ;;  %v271_v45 = vsub.f32 0.0, %v1222_v48  ;;  %v595_v61 = vadd.f32 %v592_v20, %v586_v26 }
 0x1eb   :  { %v441_v52 = vadd.f32 %v438_v44, %v432_v58  ;;  %v729_v6 = vmul.f32 %v726_v14, %v606_v24  ;;  %v270_v19 = vsub.f32 0.0, %v1204_v37  ;;  %v277_v23 = vmul.f32 1.442695, %v272_v29 }
 0x1ec   :  { %852 = vmatpush1.msra.mxu0 %v734_v27  ;;  %v275_v49 = vmul.f32 1.442695, %v271_v45  ;;  %vm341_vm13 = vcmp.ge.f32.partialorder %v1235_v56, 1.0  ;;  %v1647_v38 = vadd.f32 -1.5, %v1308_v41  ;;  %v724_v25 = vmul.f32 %v987_v21, %v595_v61 }
 0x1ed   :  { %853 = vmatprep.subr.mxu0 %v1844_v35  ;;  %v585_v1 = vmul.f32 %v956_v8, %v441_v52  ;;  %v273_v22 = vmul.f32 1.442695, %v270_v19  ;;  %v344_v50 = vsel %vm341_vm13, 1.0, %v1844_v35  ;;  %1060 = vpow2.f32 %v277_v23 }
 0x1ee   :  { %vm347_vm14 = vcmp.ge.f32.partialorder %v1235_v56, 1.4  ;;  %vm353_vm15 = vcmp.ge.f32.partialorder %v1235_v56, 1.8  ;;  %vm359_vm0 = vcmp.ge.f32.partialorder %v1235_v56, 2.2  ;;  %v733_v24 = vadd.f32 %v730_v5, %v724_v25 }
 0x1ef   :  { %v594_v57 = vadd.f32 %v591_v46, %v585_v1  ;;  %1062 = vpow2.f32 %v275_v49  ;;  %v350_v39 = vsel %vm347_vm14, 1.0, %v1844_v35  ;;  %v356_v32 = vsel %vm353_vm15, 1.0, %v1844_v35 }
 0x1f0   :  { %1064 = vpow2.f32 %v273_v22  ;;  %v362_v16 = vsel %vm359_vm0, 1.0, %v1844_v35  ;;  %v1658_v21 = vsub.f32 %v1295_v33, %v344_v50  ;;  %854 = vmatpush1.msra.mxu0 %v733_v24  ;;  %v389_v3 = vsub.f32 %v344_v50, %v350_v39 }
 0x1f1   :  { %v723_v2 = vmul.f32 %v986_v7, %v594_v57  ;;  %v392_v4 = vsub.f32 %v350_v39, %v356_v32  ;;  %v1663_v20 = vsel %vm345_vm12, 1.0, %v1844_v35  ;;  %855 = vmatprep.subr.mxu0 %v1844_v35  ;;  %v949_v34 = vadd.f32 -2.5, %v1308_v41 }
 0x1f2   :  { %v952_v30 = vadd.f32 -3.5, %v1308_v41  ;;  %v955_v5 = vadd.f32 -4.5, %v1308_v41  ;;  %v395_v33 = vsub.f32 %v356_v32, %v362_v16  ;;  %v982_v12 = vadd.f32 -1.25, %v1311_v42 }
 0x1f3   :  { %v732_v63 = vadd.f32 %v729_v6, %v723_v2  ;;  %v985_v51 = vadd.f32 -1.75, %v1311_v42  ;;  %v518_v28 = vmul.f32 %v1647_v38, %v1658_v21  ;;  %v521_v60 = vsub.f32 1.0, %v949_v34 }
 0x1f4   :  { %v533_v18 = vsub.f32 1.0, %v952_v30  ;;  %v1674_v8 = vadd.f32 -0.75, %v1311_v42  ;;  %v530_v17 = vmul.f32 %v949_v34, %v389_v3  ;;  %v542_v7 = vmul.f32 %v952_v30, %v392_v4 }
 0x1f5   :  { %856 = vmatpush1.msra.mxu0 %v732_v63  ;;  %v545_v26 = vsub.f32 1.0, %v955_v5  ;;  %v674_v58 = vsub.f32 1.0, %v982_v12  ;;  %v524_v41 = vmul.f32 %v521_v60, %v389_v3  ;;  %v686_v14 = vsub.f32 1.0, %v985_v51 }
 0x1f6   :  { %857 = vmatprep.subr.mxu0 %v1844_v35  ;;  %v536_v44 = vmul.f32 %v533_v18, %v392_v4  ;;  %vm340_vm1 = vcmp.ge.f32.partialorder %v1222_v48, 1.0  ;;  %vm346_vm2 = vcmp.ge.f32.partialorder %v1222_v48, 1.4  ;;  %vm352_vm3 = vcmp.ge.f32.partialorder %v1222_v48, 1.8 }
 0x1f7   :  { %v548_v27 = vmul.f32 %v545_v26, %v395_v33  ;;  %v343_v46 = vsel %vm340_vm1, 1.0, %v1844_v35  ;;  %v1681_v29 = vadd.f32 %v524_v41, %v518_v28  ;;  %v1684_v61 = vadd.f32 -0.5, %v1314_v43 }
 0x1f8   :  { %v539_v45 = vadd.f32 %v536_v44, %v530_v17  ;;  %v349_v52 = vsel %vm346_vm2, 1.0, %v1844_v35  ;;  %v1012_v19 = vadd.f32 -0.8333333, %v1314_v43  ;;  %v355_v23 = vsel %vm352_vm3, 1.0, %v1844_v35 }
 0x1f9   :  { %v551_v6 = vadd.f32 %v548_v27, %v542_v7  ;;  %vm358_vm4 = vcmp.ge.f32.partialorder %v1222_v48, 2.2  ;;  %v671_v49 = vmul.f32 %v1674_v8, %v1681_v29  ;;  %v1693_v22 = vsub.f32 %v1366_v36, %v343_v46 }
 0x1fa   :  { %v677_v25 = vmul.f32 %v674_v58, %v539_v45  ;;  %v683_v1 = vmul.f32 %v982_v12, %v539_v45  ;;  %v1061_v50 = vpop.eup %1060  ;;  %v361_v57 = vsel %vm358_vm4, 1.0, %v1844_v35  ;;  %v388_v39 = vsub.f32 %v343_v46, %v349_v52 }
 0x1fb   :  { %v689_v24 = vmul.f32 %v686_v14, %v551_v6  ;;  %v391_v32 = vsub.f32 %v349_v52, %v355_v23  ;;  %v281_v2 = vadd.f32 1.0, %v1061_v50  ;;  %v1699_v4 = vadd.f32 -1.5, %v1378_v10 }
 0x1fc   :  { %v1063_v16 = vpop.eup %1062  ;;  %v1696_v3 = vadd.f32 %v677_v25, %v671_v49  ;;  %v948_v34 = vadd.f32 -2.5, %v1378_v10  ;;  %v951_v36 = vadd.f32 -3.5, %v1378_v10  ;;  %v954_v33 = vadd.f32 -4.5, %v1378_v10 }
 0x1fd   :  { %v1065_v30 = vpop.eup %1064  ;;  %v280_v5 = vadd.f32 1.0, %v1063_v16  ;;  %v692_v63 = vadd.f32 %v689_v24, %v683_v1  ;;  %1066 = vrcp.f32 %v281_v2  ;;  %v812_v51 = vsub.f32 1.0, %v1012_v19 }
 0x1fe   :  { %v279_v12 = vadd.f32 1.0, %v1065_v30  ;;  %v394_v28 = vsub.f32 %v355_v23, %v361_v57  ;;  %v809_v60 = vmul.f32 %v1684_v61, %v1696_v3  ;;  %v517_v18 = vmul.f32 %v1699_v4, %v1693_v22 }
 0x1ff   :  { %1068 = vrcp.f32 %v280_v5  ;;  %v520_v17 = vsub.f32 1.0, %v948_v34  ;;  %v815_v7 = vmul.f32 %v812_v51, %v692_v63  ;;  %v532_v26 = vsub.f32 1.0, %v951_v36 }
 0x200   :  { %1070 = vrcp.f32 %v279_v12  ;;  %v544_v58 = vsub.f32 1.0, %v954_v33  ;;  %v529_v44 = vmul.f32 %v948_v34, %v388_v39  ;;  %v541_v14 = vmul.f32 %v951_v36, %v391_v32 }
 0x201   :  { %v523_v41 = vmul.f32 %v520_v17, %v388_v39  ;;  %v981_v10 = vadd.f32 -1.25, %v1381_v11  ;;  %v535_v27 = vmul.f32 %v532_v26, %v391_v32  ;;  %v1710_v45 = vadd.f32 -0.75, %v1381_v11 }
 0x202   :  { %v547_v46 = vmul.f32 %v544_v58, %v394_v28  ;;  %v984_v52 = vadd.f32 -1.75, %v1381_v11  ;;  %v1011_v23 = vadd.f32 -0.8333333, %v1384_v13  ;;  %vm351_vm5 = vcmp.ge.f32.partialorder %v1204_v37, 1.8 }
 0x203   :  { %v1713_v6 = vadd.f32 %v523_v41, %v517_v18  ;;  %v673_v19 = vsub.f32 1.0, %v981_v10  ;;  %v538_v49 = vadd.f32 %v535_v27, %v529_v44  ;;  %v354_v50 = vsel %vm351_vm5, 1.0, %v1844_v35 }
 0x204   :  { %v550_v25 = vadd.f32 %v547_v46, %v541_v14  ;;  %v685_v1 = vsub.f32 1.0, %v984_v52  ;;  %v387_v24 = vsub.f32 %v1220_v47, %v1663_v20  ;;  %v1720_v57 = vadd.f32 %v815_v7, %v809_v60 }
 0x205   :  { %v670_v39 = vmul.f32 %v1710_v45, %v1713_v6  ;;  %vm357_vm6 = vcmp.ge.f32.partialorder %v1204_v37, 2.2  ;;  %v676_v32 = vmul.f32 %v673_v19, %v538_v49  ;;  %v682_v16 = vmul.f32 %v981_v10, %v538_v49 }
 0x206   :  { %v688_v2 = vmul.f32 %v685_v1, %v550_v25  ;;  %v360_v34 = vsel %vm357_vm6, 1.0, %v1844_v35  ;;  %v390_v30 = vsub.f32 %v1663_v20, %v354_v50  ;;  %v947_v5 = vadd.f32 -2.5, %v1227_v53 }
 0x207   :  { %v950_v63 = vadd.f32 -3.5, %v1227_v53  ;;  %v953_v47 = vadd.f32 -4.5, %v1227_v53  ;;  %v1730_v36 = vadd.f32 %v676_v32, %v670_v39  ;;  %v1733_v12 = vadd.f32 -0.5, %v1384_v13 }
 0x208   :  { %v691_v33 = vadd.f32 %v688_v2, %v682_v16  ;;  %v811_v51 = vsub.f32 1.0, %v1011_v23  ;;  %v393_v28 = vsub.f32 %v354_v50, %v360_v34  ;;  %v516_v60 = vmul.f32 %v1249_v0, %v1241_v59 }
 0x209   :  { %v519_v18 = vsub.f32 1.0, %v947_v5  ;;  %v531_v17 = vsub.f32 1.0, %v950_v63  ;;  %v528_v20 = vmul.f32 %v947_v5, %v387_v24  ;;  %v543_v7 = vsub.f32 1.0, %v953_v47 }
 0x20a   :  { %v1738_v26 = vadd.f32 -0.75, %v1230_v54  ;;  %v980_v53 = vadd.f32 -1.25, %v1230_v54  ;;  %v1067_v58 = vpop.eup %1066  ;;  %v540_v14 = vmul.f32 %v950_v63, %v390_v30  ;;  %v983_v10 = vadd.f32 -1.75, %v1230_v54 }
 0x20b   :  { %v522_v41 = vmul.f32 %v519_v18, %v387_v24  ;;  %v534_v44 = vmul.f32 %v531_v17, %v390_v30  ;;  %v290_v46 = vmul.f32 %v1067_v58, %v1235_v56  ;;  %v808_v59 = vmul.f32 %v1733_v12, %v1730_v36  ;;  %v1849_v58 = vld [vmem:[#allocation5_spill] sm:$0xff] }
 0x20c   :  { %v1069_v27 = vpop.eup %1068  ;;  %v814_v0 = vmul.f32 %v811_v51, %v691_v33  ;;  %v546_v52 = vmul.f32 %v543_v7, %v393_v28  ;;  %v672_v25 = vsub.f32 1.0, %v980_v53  ;;  %v1746_v1 = vadd.f32 -0.5, %v1233_v55 }
 0x20d   :  { %v1071_v19 = vpop.eup %1070  ;;  %v525_v23 = vadd.f32 %v522_v41, %v516_v60  ;;  %v537_v49 = vadd.f32 %v534_v44, %v528_v20  ;;  %858 = vmatpush1.msra.mxu0 %v290_v46  ;;  %v289_v50 = vmul.f32 %v1069_v27, %v1222_v48  ;;  %v684_v54 = vsub.f32 1.0, %v983_v10  ;;  %v1851_v27 = vld [vmem:[#allocation9_spill] sm:$0xff] }
 0x20e   :  { %v549_v24 = vadd.f32 %v546_v52, %v540_v14  ;;  %v1010_v39 = vadd.f32 -0.8333333, %v1233_v55  ;;  %859 = vmatprep.subr.mxu0 %v1844_v35  ;;  %v509_v2 = vsub.f32 1.0, %v1647_v38  ;;  %v288_v34 = vmul.f32 %v1071_v19, %v1204_v37 }
 0x20f   :  { %v669_v56 = vmul.f32 %v1738_v26, %v525_v23  ;;  %v675_v32 = vmul.f32 %v672_v25, %v537_v49  ;;  %v681_v16 = vmul.f32 %v980_v53, %v537_v49  ;;  %860 = vmatpush1.msra.mxu0 %v289_v50  ;;  %v817_v30 = vadd.f32 %v814_v0, %v808_v59  ;;  %v1848_v53 = vld [vmem:[#allocation7_spill] sm:$0xff] }
 0x210   :  { %v687_v5 = vmul.f32 %v684_v54, %v549_v24  ;;  %v506_v48 = vmul.f32 %v1333_v62, %v1305_v40  ;;  %861 = vmatprep.subr.mxu0 %v1844_v35  ;;  %v810_v47 = vsub.f32 1.0, %v1010_v39  ;;  %v512_v33 = vmul.f32 %v509_v2, %v1658_v21 }
 0x211   :  { %v678_v63 = vadd.f32 %v675_v32, %v669_v56  ;;  %v662_v51 = vsub.f32 1.0, %v1674_v8  ;;  %862 = vmatpush1.msra.mxu0 %v288_v34  ;;  %v976_v38 = vadd.f32 -0.25, %v1311_v42  ;;  %v1006_v60 = vadd.f32 -0.16666667, %v1314_v43 }
 0x212   :  { %v690_v28 = vadd.f32 %v687_v5, %v681_v16  ;;  %v508_v37 = vsub.f32 1.0, %v1699_v4  ;;  %873 = vmatprep.subr.mxu0 %v1844_v35  ;;  %v515_v62 = vadd.f32 %v512_v33, %v506_v48  ;;  %v800_v17 = vsub.f32 1.0, %v1684_v61  ;;  %v820_v5 = vld [vmem:[%s1818_s5 + $0x8] sm:$0xff]  ;;  %v1853_v33 = vld [vmem:[#allocation8_spill] sm:$0xff] }
 0x213   :  { %v807_v40 = vmul.f32 %v1746_v1, %v678_v63  ;;  %v665_v18 = vmul.f32 %v662_v51, %v1681_v29  ;;  %874 = vmatpush2.msra.mxu0 %v1720_v57  ;;  %v505_v8 = vmul.f32 %v1405_v31, %v1375_v9  ;;  %v661_v20 = vsub.f32 1.0, %v1710_v45  ;;  %v1854_v51 = vld [vmem:[#allocation6_spill] sm:$0xff] }
 0x214   :  { %v813_v21 = vmul.f32 %v810_v47, %v690_v28  ;;  %v511_v42 = vmul.f32 %v508_v37, %v1693_v22  ;;  %875 = vmatprep.subr.mxu0 %v1844_v35  ;;  %v659_v4 = vmul.f32 %v976_v38, %v515_v62  ;;  %v803_v7 = vmul.f32 %v800_v17, %v1696_v3 }
 0x215   :  { %v657_v29 = vmul.f32 %v1849_v58, %v1848_v53  ;;  %v660_v61 = vsub.f32 1.0, %v1738_v26  ;;  %876 = vmatpush2.msra.mxu0 %v817_v30  ;;  %v975_v44 = vadd.f32 -0.25, %v1381_v11  ;;  %v664_v9 = vmul.f32 %v661_v20, %v1713_v6  ;;  %v1850_v26 = vld [vmem:[#allocation11_spill] sm:$0xff]  ;;  %v1858_v20 = vld [vmem:[#allocation14_spill] sm:$0xff] }
 0x216   :  { %v816_v57 = vadd.f32 %v813_v21, %v807_v40  ;;  %v514_v41 = vadd.f32 %v511_v42, %v505_v8  ;;  %877 = vmatprep.subr.mxu0 %v1844_v35  ;;  %v668_v31 = vadd.f32 %v665_v18, %v659_v4  ;;  %v1005_v22 = vadd.f32 -0.16666667, %v1384_v13  ;;  %v1855_v40 = vld [vmem:[#allocation12_spill] sm:$0xff]  ;;  %v1857_v42 = vld [vmem:[#allocation15_spill] sm:$0xff] }
 0x217   :  { %v799_v45 = vsub.f32 1.0, %v1733_v12  ;;  %v663_v3 = vmul.f32 %v660_v61, %v525_v23  ;;  %v1004_v10 = vadd.f32 -0.16666667, %v1233_v55  ;;  %v647_v46 = vmul.f32 %v1851_v27, %v1850_v26  ;;  %v1852_v12 = vld [vmem:[#allocation13_spill] sm:$0xff]  ;;  %v825_v61 = vpop.permute.xlu1 %824 }
 0x218   :  { %878 = vmatpush2.msra.mxu0 %v816_v57  ;;  %v658_v14 = vmul.f32 %v975_v44, %v514_v41  ;;  %v650_v59 = vsub.f32 1.0, %v976_v38  ;;  %v797_v11 = vmul.f32 %v1006_v60, %v668_v31  ;;  %v798_v52 = vsub.f32 1.0, %v1746_v1 }
 0x219   :  { %879 = vmatprep.subr.mxu0 %v1844_v35  ;;  %v802_v6 = vmul.f32 %v799_v45, %v1730_v36  ;;  %v666_v0 = vadd.f32 %v663_v3, %v657_v29  ;;  %v646_v23 = vmul.f32 %v1852_v12, %v1437_v15  ;;  %v649_v25 = vsub.f32 1.0, %v975_v44  ;;  %v819_v29 = vld [vmem:[%s1818_s5] sm:$0xff] }
 0x21a   :  { %v667_v19 = vadd.f32 %v664_v9, %v658_v14  ;;  %v653_v49 = vmul.f32 %v650_v59, %v515_v62  ;;  %v806_v50 = vadd.f32 %v803_v7, %v797_v11  ;;  %v801_v24 = vmul.f32 %v798_v52, %v678_v63  ;;  %v1856_v62 = vld [vmem:[#allocation10_spill] sm:$0xff] }
 0x21b   :  { %v795_v55 = vmul.f32 %v1004_v10, %v666_v0  ;;  %v788_v54 = vsub.f32 1.0, %v1006_v60  ;;  %v1003_v32 = vadd.f32 0.16666667, %v1314_v43  ;;  %v652_v16 = vmul.f32 %v649_v25, %v514_v41 }
 0x21c   :  { %v796_v39 = vmul.f32 %v1005_v22, %v667_v19  ;;  %v656_v56 = vadd.f32 %v653_v49, %v647_v46  ;;  %880 = vmatpush2.msra.mxu0 %v806_v50  ;;  %v1002_v2 = vadd.f32 0.16666667, %v1384_v13  ;;  %v787_v15 = vsub.f32 1.0, %v1005_v22 }
 0x21d   :  { %v791_v36 = vmul.f32 %v788_v54, %v668_v31  ;;  %881 = vmatprep.subr.mxu0 %v1844_v35  ;;  %v655_v30 = vadd.f32 %v652_v16, %v646_v23  ;;  %v804_v48 = vadd.f32 %v801_v24, %v795_v55  ;;  %v786_v43 = vsub.f32 1.0, %v1004_v10 }
 0x21e   :  { %v805_v1 = vadd.f32 %v802_v6, %v796_v39  ;;  %v785_v34 = vmul.f32 %v1003_v32, %v656_v56  ;;  %v790_v47 = vmul.f32 %v787_v15, %v667_v19  ;;  %vm827_vm7 = vcmask 719872  }
 0x21f   :  { %v784_v63 = vmul.f32 %v1002_v2, %v655_v30  ;;  %1013 = vmatprep.mubr.msk.f32.mxu0 %vm827_vm7, %v820_v5  ;;  %v783_v28 = vmul.f32 %v1854_v51, %v1853_v33  ;;  %v789_v38 = vmul.f32 %v786_v43, %v666_v0  ;;  %v776_v60 = vsub.f32 1.0, %v1003_v32 }
 0x220   :  { %882 = vmatpush2.msra.mxu0 %v805_v1  ;;  %v794_v13 = vadd.f32 %v791_v36, %v785_v34  ;;  %v773_v18 = vmul.f32 %v1856_v62, %v1855_v40  ;;  %v775_v21 = vsub.f32 1.0, %v1002_v2  ;;  %v772_v4 = vmul.f32 %v1858_v20, %v1857_v42 }
 0x221   :  { %883 = vmatprep.subr.mxu0 %v1844_v35  ;;  %v793_v37 = vadd.f32 %v790_v47, %v784_v63  ;;  %v779_v17 = vmul.f32 %v776_v60, %v656_v56  ;;  %v792_v8 = vadd.f32 %v789_v38, %v783_v28 }
 0x222   :  { %884 = vmatpush2.msra.mxu0 %v804_v48  ;;  %v778_v7 = vmul.f32 %v775_v21, %v655_v30 }
 0x223   :  { %885 = vmatprep.subr.mxu0 %v1844_v35  ;;  %v782_v53 = vadd.f32 %v779_v17, %v773_v18 }
 0x224   :  { %886 = vmatpush2.msra.mxu0 %v794_v13  ;;  %v781_v58 = vadd.f32 %v778_v7, %v772_v4 }
 0x225   :  { %887 = vmatprep.subr.mxu0 %v1844_v35 }
 0x226   :  { %888 = vmatpush2.msra.mxu0 %v793_v37 }
 0x227   :  { %889 = vmatprep.subr.mxu0 %v1844_v35 }
 0x228   :  { %890 = vmatpush2.msra.mxu0 %v792_v8 }
 0x229   :  { %891 = vmatprep.subr.mxu0 %v1844_v35 }
 0x22a   :  { %892 = vmatpush2.msra.mxu0 %v782_v53 }
 0x22b   :  { %893 = vmatprep.subr.mxu0 %v1844_v35 }
 0x22c   :  { %894 = vmatpush2.msra.mxu0 %v781_v58 }
 0x22d   :  { %896 = vmatmul.mubr.f32.vlgmr.msra.gmra.mxu0 %v819_v29 }
 0x2ed   :  { %v897_v57 = vpop.f32.mrf.mxu0 }
 0x2ee   :  { %v898_v41 = vadd.f32 %v897_v57, %v825_v61 }
 0x2ef   :  { %v899_v44 = vpop.f32.mrf.mxu0 }
 0x2f0   :  { %901 = vst [vmem:[#allocation2] sm:$0xff] %v898_v41 }
 0x2f1   :  { %1083 = shalt.err (!%p1080_p4)
}
 0x2f2   :  { %911 = dma.vmem_to_hbm [thread:$0]  %s909_s0, 128, %s1820_s7, [#allocation3]  }
 0x2f3   :  { %1092 = dma.done.wait [#allocation3], 128  }
 0x2f4   :  { %1093 = vsyncadd [#allocation3], 4294967168 }
 0x2f5   :  { %915 = vsyncpa [#allocation3], 1 }

</bundles_post_ra>
